<compile_context>
chip_gen: v5e
topology: v5e:2x2
jax: 0.10.0
libtpu: 0.0.40
codegen_flags: <defaults>
</compile_context>

<pallas_src>
import functools

import jax
import jax.numpy as jnp
from jax import lax
from jax.experimental import pallas as pl
from jax.experimental.pallas import tpu as pltpu


def _st_encoder_kernel(x_ref, wconv_ref, bconv_ref, wih_ref, whh_ref, bih_ref, bhh_ref,
                       out_ref):
    # Shapes:
    #   x_ref     : (T, B, C_in)      f32 time-major input (B padded to a multiple of 8)
    #   wconv_ref : (K, C_in, C_out)  f32 conv taps
    #   bconv_ref : (1, C_out)        f32
    #   wih_ref   : (3, C_out, H)     bf16, gate order [r, z, n]
    #   whh_ref   : (3, H, H)         bf16, gate order [r, z, n]
    #   bih_ref   : (3, 1, H)         f32
    #   bhh_ref   : (3, 1, H)         f32
    #   out_ref   : (B, H)            final hidden state (f32)
    T, B, C_in = x_ref.shape
    K = wconv_ref.shape[0]
    C_out = wconv_ref.shape[2]
    H = out_ref.shape[1]

    # ---- Conv1d(k=3, stride=1, padding=1) + ReLU (prologue-only work, f32) ----
    x = x_ref[...]                                            # (T, B, C_in) f32
    zpad = jnp.zeros((1, B, C_in), jnp.float32)
    xpad = jnp.concatenate([zpad, x, zpad], axis=0)           # (T+2, B, C_in)

    acc = jnp.zeros((T * B, C_out), jnp.float32)
    for k in range(K):                                        # K = 3, static unroll
        xk = xpad[k:k + T].reshape(T * B, C_in)               # (T*B, C_in) time-major rows
        acc = acc + jnp.dot(xk, wconv_ref[k],
                            preferred_element_type=jnp.float32)
    x_embed = jnp.maximum(acc + bconv_ref[...], 0.0)          # (T*B, C_out) f32
    xe_b = x_embed.astype(jnp.bfloat16)

    # ---- Hoisted GRU input projection, per gate (independent of h) ----
    gi_r = jnp.dot(xe_b, wih_ref[0], preferred_element_type=jnp.float32) + bih_ref[0]
    gi_z = jnp.dot(xe_b, wih_ref[1], preferred_element_type=jnp.float32) + bih_ref[1]
    gi_n = jnp.dot(xe_b, wih_ref[2], preferred_element_type=jnp.float32) + bih_ref[2]

    # ---- Per-gate hidden weights / biases, loaded once ----
    whh_r, whh_z, whh_n = whh_ref[0], whh_ref[1], whh_ref[2]      # (H, H) bf16
    bhh_r, bhh_z, bhh_n = bhh_ref[0], bhh_ref[1], bhh_ref[2]      # (1, H) f32

    # ---- GRU recurrence (PyTorch gate order r, z, n), fully unrolled ----
    h = jnp.zeros((B, H), jnp.float32)
    for t in range(T):                                        # T is static -> unrolled
        lo, hi = t * B, (t + 1) * B                           # sublane-aligned static slice
        hb = h.astype(jnp.bfloat16)
        gh_r = jnp.dot(hb, whh_r, preferred_element_type=jnp.float32) + bhh_r
        gh_z = jnp.dot(hb, whh_z, preferred_element_type=jnp.float32) + bhh_z
        gh_n = jnp.dot(hb, whh_n, preferred_element_type=jnp.float32) + bhh_n
        r = jax.nn.sigmoid(gi_r[lo:hi] + gh_r)
        z = jax.nn.sigmoid(gi_z[lo:hi] + gh_z)
        n = jnp.tanh(gi_n[lo:hi] + r * gh_n)                  # r also gates bhh_n (PyTorch)
        h = (1.0 - z) * n + z * h

    out_ref[...] = h


@jax.jit
def st_encoder_forward(x, wconv, bconv, wih_t, whh_t, bih, bhh):
    """x: (B, T, C_in) f32.  Params in the layout produced by make_params. Returns (B, H)."""
    B, T, C_in = x.shape
    K, _, C_out = wconv.shape
    H = whh_t.shape[0]

    # Pad batch to a multiple of 8 (sublane width) and go time-major (layout plumbing).
    Bp = max(8, ((B + 7) // 8) * 8)
    x_p = jnp.pad(x, ((0, Bp - B), (0, 0), (0, 0))) if Bp != B else x
    x_tm = jnp.transpose(x_p, (1, 0, 2))                          # (T, Bp, C_in)

    # Per-gate weight/bias split; MXU operands pre-cast to bf16.
    wih_g = jnp.transpose(wih_t.reshape(C_out, 3, H), (1, 0, 2)).astype(jnp.bfloat16)
    whh_g = jnp.transpose(whh_t.reshape(H, 3, H), (1, 0, 2)).astype(jnp.bfloat16)
    bih_g = jnp.transpose(bih.reshape(1, 3, H), (1, 0, 2))        # (3, 1, H) f32
    bhh_g = jnp.transpose(bhh.reshape(1, 3, H), (1, 0, 2))        # (3, 1, H) f32

    out = pl.pallas_call(
        _st_encoder_kernel,
        out_shape=jax.ShapeDtypeStruct((Bp, H), jnp.float32),
        in_specs=[pl.BlockSpec(memory_space=pltpu.MemorySpace.VMEM)] * 7,
        out_specs=pl.BlockSpec(memory_space=pltpu.MemorySpace.VMEM),
    )(x_tm, wconv, bconv, wih_g, whh_g, bih_g, bhh_g)
    return out[:B]


def st_encoder_reference(x, wconv, bconv, wih_t, whh_t, bih, bhh):
    """Pure-JAX f32 reference matching the PyTorch forward semantics."""
    B, T, C_in = x.shape
    K, _, C_out = wconv.shape
    H = whh_t.shape[0]
    xp = jnp.pad(x, ((0, 0), (1, 1), (0, 0)))
    x_embed = sum(jnp.einsum('btc,co->bto', xp[:, k:k + T, :], wconv[k])
                  for k in range(K)) + bconv
    x_embed = jnp.maximum(x_embed, 0.0)                       # (B, T, C_out)

    def step(h, xt):
        gi = xt @ wih_t + bih
        gh = h @ whh_t + bhh
        r = jax.nn.sigmoid(gi[:, :H] + gh[:, :H])
        z = jax.nn.sigmoid(gi[:, H:2 * H] + gh[:, H:2 * H])
        n = jnp.tanh(gi[:, 2 * H:] + r * gh[:, 2 * H:])
        h_new = (1.0 - z) * n + z * h
        return h_new, None

    h0 = jnp.zeros((B, H), jnp.float32)
    h_final, _ = lax.scan(step, h0, jnp.transpose(x_embed, (1, 0, 2)))
    return h_final


def make_params(key, dim=64, c_in=2, c_out=16, k=3):
    """Deterministic Kaiming-normal style init matching st_encoder.reset_parameters()."""
    k1, k2, k3 = jax.random.split(key, 3)
    w_conv_torch = jax.random.normal(k1, (c_out, c_in, k), jnp.float32) * jnp.sqrt(2.0 / (c_in * k))
    wconv = jnp.transpose(w_conv_torch, (2, 1, 0))            # (K, C_in, C_out)
    bconv = jnp.zeros((1, c_out), jnp.float32)
    w_ih = jax.random.normal(k2, (3 * dim, c_out), jnp.float32) * jnp.sqrt(2.0 / c_out)
    w_hh = jax.random.normal(k3, (3 * dim, dim), jnp.float32) * jnp.sqrt(2.0 / dim)
    wih_t = jnp.transpose(w_ih)                               # (C_out, 3*dim), gate order [r,z,n]
    whh_t = jnp.transpose(w_hh)                               # (dim, 3*dim)
    bih = jnp.zeros((1, 3 * dim), jnp.float32)
    bhh = jnp.zeros((1, 3 * dim), jnp.float32)
    return wconv, bconv, wih_t, whh_t, bih, bhh


if __name__ == "__main__":
    B, T, C_IN, DIM = 4, 8, 2, 64
    key = jax.random.PRNGKey(0)
    kx, kp = jax.random.split(key)
    x = jax.random.normal(kx, (B, T, C_IN), jnp.float32)
    params = make_params(kp, dim=DIM, c_in=C_IN)

    out = st_encoder_forward(x, *params)
    out = jax.block_until_ready(out)

    ref = st_encoder_reference(x, *params)
    assert out.shape == (B, DIM)
    # bf16 MXU operands in the GRU -> loosened tolerance vs the f32 reference
    # (gate math / accumulation stay f32, so drift over T=8 steps is small).
    assert jnp.allclose(out, ref, atol=5e-2, rtol=5e-2), float(jnp.max(jnp.abs(out - ref)))
    print("KERNEL_OK")
</pallas_src>

<mosaic_0001>
module attributes {stable_mosaic.version = 11 : i64} {
  func.func @_st_encoder_kernel(%arg0: memref<8x8x2xf32, #tpu.memory_space<vmem>>, %arg1: memref<3x2x16xf32, #tpu.memory_space<vmem>>, %arg2: memref<1x16xf32, #tpu.memory_space<vmem>>, %arg3: memref<3x16x64xbf16, #tpu.memory_space<vmem>>, %arg4: memref<3x64x64xbf16, #tpu.memory_space<vmem>>, %arg5: memref<3x1x64xf32, #tpu.memory_space<vmem>>, %arg6: memref<3x1x64xf32, #tpu.memory_space<vmem>>, %arg7: memref<8x64xf32, #tpu.memory_space<vmem>>) attributes {dimension_semantics = [], scalar_prefetch = 0 : i64, scratch_operands = 0 : i64, tpu.core_type = #tpu.core_type<tc>} {
    %c0 = arith.constant 0 : index
    %c0_0 = arith.constant 0 : index
    %c0_1 = arith.constant 0 : index
    %0 = vector.load %arg0[%c0, %c0_0, %c0_1] : memref<8x8x2xf32, #tpu.memory_space<vmem>>, vector<8x8x2xf32>
    %cst = arith.constant 0.000000e+00 : f32
    %1 = vector.broadcast %cst : f32 to vector<1x8x2xf32>
    %2 = tpu.concatenate %1, %0, %1 in 0 : vector<1x8x2xf32>, vector<8x8x2xf32>, vector<1x8x2xf32> -> vector<10x8x2xf32>
    %cst_2 = arith.constant 0.000000e+00 : f32
    %3 = vector.broadcast %cst_2 : f32 to vector<64x16xf32>
    %4 = vector.extract_strided_slice %2 {offsets = [0, 0, 0], sizes = [8, 8, 2], strides = [1, 1, 1]} : vector<10x8x2xf32> to vector<8x8x2xf32>
    %5 = vector.shape_cast %4 : vector<8x8x2xf32> to vector<64x2xf32>
    %c0_3 = arith.constant 0 : index
    %c0_4 = arith.constant 0 : index
    %c0_5 = arith.constant 0 : index
    %6 = vector.load %arg1[%c0_3, %c0_4, %c0_5] : memref<3x2x16xf32, #tpu.memory_space<vmem>>, vector<1x2x16xf32>
    %7 = vector.shape_cast %6 : vector<1x2x16xf32> to vector<2x16xf32>
    %cst_6 = arith.constant dense<0.000000e+00> : vector<64x16xf32>
    %8 = tpu.matmul %5, %7, %cst_6 {dimension_numbers = #tpu.dot_dimension_numbers<[1], [0], [0], [1], [0, 0, 1, 1], [], []>} : vector<64x2xf32>, vector<2x16xf32>, vector<64x16xf32> -> vector<64x16xf32>
    %9 = arith.addf %3, %8 : vector<64x16xf32>
    %10 = vector.extract_strided_slice %2 {offsets = [1, 0, 0], sizes = [8, 8, 2], strides = [1, 1, 1]} : vector<10x8x2xf32> to vector<8x8x2xf32>
    %11 = vector.shape_cast %10 : vector<8x8x2xf32> to vector<64x2xf32>
    %c1 = arith.constant 1 : index
    %c0_7 = arith.constant 0 : index
    %c0_8 = arith.constant 0 : index
    %12 = vector.load %arg1[%c1, %c0_7, %c0_8] : memref<3x2x16xf32, #tpu.memory_space<vmem>>, vector<1x2x16xf32>
    %13 = vector.shape_cast %12 : vector<1x2x16xf32> to vector<2x16xf32>
    %cst_9 = arith.constant dense<0.000000e+00> : vector<64x16xf32>
    %14 = tpu.matmul %11, %13, %cst_9 {dimension_numbers = #tpu.dot_dimension_numbers<[1], [0], [0], [1], [0, 0, 1, 1], [], []>} : vector<64x2xf32>, vector<2x16xf32>, vector<64x16xf32> -> vector<64x16xf32>
    %15 = arith.addf %9, %14 : vector<64x16xf32>
    %16 = vector.extract_strided_slice %2 {offsets = [2, 0, 0], sizes = [8, 8, 2], strides = [1, 1, 1]} : vector<10x8x2xf32> to vector<8x8x2xf32>
    %17 = vector.shape_cast %16 : vector<8x8x2xf32> to vector<64x2xf32>
    %c2 = arith.constant 2 : index
    %c0_10 = arith.constant 0 : index
    %c0_11 = arith.constant 0 : index
    %18 = vector.load %arg1[%c2, %c0_10, %c0_11] : memref<3x2x16xf32, #tpu.memory_space<vmem>>, vector<1x2x16xf32>
    %19 = vector.shape_cast %18 : vector<1x2x16xf32> to vector<2x16xf32>
    %cst_12 = arith.constant dense<0.000000e+00> : vector<64x16xf32>
    %20 = tpu.matmul %17, %19, %cst_12 {dimension_numbers = #tpu.dot_dimension_numbers<[1], [0], [0], [1], [0, 0, 1, 1], [], []>} : vector<64x2xf32>, vector<2x16xf32>, vector<64x16xf32> -> vector<64x16xf32>
    %21 = arith.addf %15, %20 : vector<64x16xf32>
    %c0_13 = arith.constant 0 : index
    %c0_14 = arith.constant 0 : index
    %22 = vector.load %arg2[%c0_13, %c0_14] : memref<1x16xf32, #tpu.memory_space<vmem>>, vector<1x16xf32>
    %23 = vector.broadcast %22 : vector<1x16xf32> to vector<64x16xf32>
    %24 = arith.addf %21, %23 : vector<64x16xf32>
    %cst_15 = arith.constant 0.000000e+00 : f32
    %25 = vector.broadcast %cst_15 : f32 to vector<64x16xf32>
    %26 = arith.maximumf %24, %25 : vector<64x16xf32>
    %27 = arith.truncf %26 : vector<64x16xf32> to vector<64x16xbf16>
    %c0_16 = arith.constant 0 : index
    %c0_17 = arith.constant 0 : index
    %c0_18 = arith.constant 0 : index
    %28 = vector.load %arg3[%c0_16, %c0_17, %c0_18] : memref<3x16x64xbf16, #tpu.memory_space<vmem>>, vector<1x16x64xbf16>
    %29 = vector.shape_cast %28 : vector<1x16x64xbf16> to vector<16x64xbf16>
    %cst_19 = arith.constant dense<0.000000e+00> : vector<64x64xf32>
    %30 = tpu.matmul %27, %29, %cst_19 {dimension_numbers = #tpu.dot_dimension_numbers<[1], [0], [0], [1], [0, 0, 1, 1], [], []>} : vector<64x16xbf16>, vector<16x64xbf16>, vector<64x64xf32> -> vector<64x64xf32>
    %c0_20 = arith.constant 0 : index
    %c0_21 = arith.constant 0 : index
    %c0_22 = arith.constant 0 : index
    %31 = vector.load %arg5[%c0_20, %c0_21, %c0_22] : memref<3x1x64xf32, #tpu.memory_space<vmem>>, vector<1x1x64xf32>
    %32 = vector.shape_cast %31 : vector<1x1x64xf32> to vector<1x64xf32>
    %33 = vector.broadcast %32 : vector<1x64xf32> to vector<64x64xf32>
    %34 = arith.addf %30, %33 : vector<64x64xf32>
    %c1_23 = arith.constant 1 : index
    %c0_24 = arith.constant 0 : index
    %c0_25 = arith.constant 0 : index
    %35 = vector.load %arg3[%c1_23, %c0_24, %c0_25] : memref<3x16x64xbf16, #tpu.memory_space<vmem>>, vector<1x16x64xbf16>
    %36 = vector.shape_cast %35 : vector<1x16x64xbf16> to vector<16x64xbf16>
    %cst_26 = arith.constant dense<0.000000e+00> : vector<64x64xf32>
    %37 = tpu.matmul %27, %36, %cst_26 {dimension_numbers = #tpu.dot_dimension_numbers<[1], [0], [0], [1], [0, 0, 1, 1], [], []>} : vector<64x16xbf16>, vector<16x64xbf16>, vector<64x64xf32> -> vector<64x64xf32>
    %c1_27 = arith.constant 1 : index
    %c0_28 = arith.constant 0 : index
    %c0_29 = arith.constant 0 : index
    %38 = vector.load %arg5[%c1_27, %c0_28, %c0_29] : memref<3x1x64xf32, #tpu.memory_space<vmem>>, vector<1x1x64xf32>
    %39 = vector.shape_cast %38 : vector<1x1x64xf32> to vector<1x64xf32>
    %40 = vector.broadcast %39 : vector<1x64xf32> to vector<64x64xf32>
    %41 = arith.addf %37, %40 : vector<64x64xf32>
    %c2_30 = arith.constant 2 : index
    %c0_31 = arith.constant 0 : index
    %c0_32 = arith.constant 0 : index
    %42 = vector.load %arg3[%c2_30, %c0_31, %c0_32] : memref<3x16x64xbf16, #tpu.memory_space<vmem>>, vector<1x16x64xbf16>
    %43 = vector.shape_cast %42 : vector<1x16x64xbf16> to vector<16x64xbf16>
    %cst_33 = arith.constant dense<0.000000e+00> : vector<64x64xf32>
    %44 = tpu.matmul %27, %43, %cst_33 {dimension_numbers = #tpu.dot_dimension_numbers<[1], [0], [0], [1], [0, 0, 1, 1], [], []>} : vector<64x16xbf16>, vector<16x64xbf16>, vector<64x64xf32> -> vector<64x64xf32>
    %c2_34 = arith.constant 2 : index
    %c0_35 = arith.constant 0 : index
    %c0_36 = arith.constant 0 : index
    %45 = vector.load %arg5[%c2_34, %c0_35, %c0_36] : memref<3x1x64xf32, #tpu.memory_space<vmem>>, vector<1x1x64xf32>
    %46 = vector.shape_cast %45 : vector<1x1x64xf32> to vector<1x64xf32>
    %47 = vector.broadcast %46 : vector<1x64xf32> to vector<64x64xf32>
    %48 = arith.addf %44, %47 : vector<64x64xf32>
    %c0_37 = arith.constant 0 : index
    %c0_38 = arith.constant 0 : index
    %c0_39 = arith.constant 0 : index
    %49 = vector.load %arg4[%c0_37, %c0_38, %c0_39] : memref<3x64x64xbf16, #tpu.memory_space<vmem>>, vector<1x64x64xbf16>
    %50 = vector.shape_cast %49 : vector<1x64x64xbf16> to vector<64x64xbf16>
    %c1_40 = arith.constant 1 : index
    %c0_41 = arith.constant 0 : index
    %c0_42 = arith.constant 0 : index
    %51 = vector.load %arg4[%c1_40, %c0_41, %c0_42] : memref<3x64x64xbf16, #tpu.memory_space<vmem>>, vector<1x64x64xbf16>
    %52 = vector.shape_cast %51 : vector<1x64x64xbf16> to vector<64x64xbf16>
    %c2_43 = arith.constant 2 : index
    %c0_44 = arith.constant 0 : index
    %c0_45 = arith.constant 0 : index
    %53 = vector.load %arg4[%c2_43, %c0_44, %c0_45] : memref<3x64x64xbf16, #tpu.memory_space<vmem>>, vector<1x64x64xbf16>
    %54 = vector.shape_cast %53 : vector<1x64x64xbf16> to vector<64x64xbf16>
    %c0_46 = arith.constant 0 : index
    %c0_47 = arith.constant 0 : index
    %c0_48 = arith.constant 0 : index
    %55 = vector.load %arg6[%c0_46, %c0_47, %c0_48] : memref<3x1x64xf32, #tpu.memory_space<vmem>>, vector<1x1x64xf32>
    %56 = vector.shape_cast %55 : vector<1x1x64xf32> to vector<1x64xf32>
    %c1_49 = arith.constant 1 : index
    %c0_50 = arith.constant 0 : index
    %c0_51 = arith.constant 0 : index
    %57 = vector.load %arg6[%c1_49, %c0_50, %c0_51] : memref<3x1x64xf32, #tpu.memory_space<vmem>>, vector<1x1x64xf32>
    %58 = vector.shape_cast %57 : vector<1x1x64xf32> to vector<1x64xf32>
    %c2_52 = arith.constant 2 : index
    %c0_53 = arith.constant 0 : index
    %c0_54 = arith.constant 0 : index
    %59 = vector.load %arg6[%c2_52, %c0_53, %c0_54] : memref<3x1x64xf32, #tpu.memory_space<vmem>>, vector<1x1x64xf32>
    %60 = vector.shape_cast %59 : vector<1x1x64xf32> to vector<1x64xf32>
    %cst_55 = arith.constant 0.000000e+00 : f32
    %61 = vector.broadcast %cst_55 : f32 to vector<8x64xf32>
    %62 = arith.truncf %61 : vector<8x64xf32> to vector<8x64xbf16>
    %cst_56 = arith.constant dense<0.000000e+00> : vector<8x64xf32>
    %63 = tpu.matmul %62, %50, %cst_56 {dimension_numbers = #tpu.dot_dimension_numbers<[1], [0], [0], [1], [0, 0, 1, 1], [], []>} : vector<8x64xbf16>, vector<64x64xbf16>, vector<8x64xf32> -> vector<8x64xf32>
    %64 = vector.broadcast %56 : vector<1x64xf32> to vector<8x64xf32>
    %65 = arith.addf %63, %64 : vector<8x64xf32>
    %cst_57 = arith.constant dense<0.000000e+00> : vector<8x64xf32>
    %66 = tpu.matmul %62, %52, %cst_57 {dimension_numbers = #tpu.dot_dimension_numbers<[1], [0], [0], [1], [0, 0, 1, 1], [], []>} : vector<8x64xbf16>, vector<64x64xbf16>, vector<8x64xf32> -> vector<8x64xf32>
    %67 = vector.broadcast %58 : vector<1x64xf32> to vector<8x64xf32>
    %68 = arith.addf %66, %67 : vector<8x64xf32>
    %cst_58 = arith.constant dense<0.000000e+00> : vector<8x64xf32>
    %69 = tpu.matmul %62, %54, %cst_58 {dimension_numbers = #tpu.dot_dimension_numbers<[1], [0], [0], [1], [0, 0, 1, 1], [], []>} : vector<8x64xbf16>, vector<64x64xbf16>, vector<8x64xf32> -> vector<8x64xf32>
    %70 = vector.broadcast %60 : vector<1x64xf32> to vector<8x64xf32>
    %71 = arith.addf %69, %70 : vector<8x64xf32>
    %72 = vector.extract_strided_slice %34 {offsets = [0, 0], sizes = [8, 64], strides = [1, 1]} : vector<64x64xf32> to vector<8x64xf32>
    %73 = arith.addf %72, %65 : vector<8x64xf32>
    %74 = arith.negf %73 : vector<8x64xf32>
    %75 = math.exp %74 : vector<8x64xf32>
    %cst_59 = arith.constant 1.000000e+00 : f32
    %76 = vector.broadcast %cst_59 : f32 to vector<8x64xf32>
    %77 = arith.addf %76, %75 : vector<8x64xf32>
    %78 = arith.divf %76, %77 : vector<8x64xf32>
    %79 = vector.extract_strided_slice %41 {offsets = [0, 0], sizes = [8, 64], strides = [1, 1]} : vector<64x64xf32> to vector<8x64xf32>
    %80 = arith.addf %79, %68 : vector<8x64xf32>
    %81 = arith.negf %80 : vector<8x64xf32>
    %82 = math.exp %81 : vector<8x64xf32>
    %cst_60 = arith.constant 1.000000e+00 : f32
    %83 = vector.broadcast %cst_60 : f32 to vector<8x64xf32>
    %84 = arith.addf %83, %82 : vector<8x64xf32>
    %85 = arith.divf %83, %84 : vector<8x64xf32>
    %86 = vector.extract_strided_slice %48 {offsets = [0, 0], sizes = [8, 64], strides = [1, 1]} : vector<64x64xf32> to vector<8x64xf32>
    %87 = arith.mulf %78, %71 : vector<8x64xf32>
    %88 = arith.addf %86, %87 : vector<8x64xf32>
    %89 = math.tanh %88 : vector<8x64xf32>
    %cst_61 = arith.constant 1.000000e+00 : f32
    %90 = vector.broadcast %cst_61 : f32 to vector<8x64xf32>
    %91 = arith.subf %90, %85 : vector<8x64xf32>
    %92 = arith.mulf %91, %89 : vector<8x64xf32>
    %93 = arith.mulf %85, %61 : vector<8x64xf32>
    %94 = arith.addf %92, %93 : vector<8x64xf32>
    %95 = arith.truncf %94 : vector<8x64xf32> to vector<8x64xbf16>
    %cst_62 = arith.constant dense<0.000000e+00> : vector<8x64xf32>
    %96 = tpu.matmul %95, %50, %cst_62 {dimension_numbers = #tpu.dot_dimension_numbers<[1], [0], [0], [1], [0, 0, 1, 1], [], []>} : vector<8x64xbf16>, vector<64x64xbf16>, vector<8x64xf32> -> vector<8x64xf32>
    %97 = vector.broadcast %56 : vector<1x64xf32> to vector<8x64xf32>
    %98 = arith.addf %96, %97 : vector<8x64xf32>
    %cst_63 = arith.constant dense<0.000000e+00> : vector<8x64xf32>
    %99 = tpu.matmul %95, %52, %cst_63 {dimension_numbers = #tpu.dot_dimension_numbers<[1], [0], [0], [1], [0, 0, 1, 1], [], []>} : vector<8x64xbf16>, vector<64x64xbf16>, vector<8x64xf32> -> vector<8x64xf32>
    %100 = vector.broadcast %58 : vector<1x64xf32> to vector<8x64xf32>
    %101 = arith.addf %99, %100 : vector<8x64xf32>
    %cst_64 = arith.constant dense<0.000000e+00> : vector<8x64xf32>
    %102 = tpu.matmul %95, %54, %cst_64 {dimension_numbers = #tpu.dot_dimension_numbers<[1], [0], [0], [1], [0, 0, 1, 1], [], []>} : vector<8x64xbf16>, vector<64x64xbf16>, vector<8x64xf32> -> vector<8x64xf32>
    %103 = vector.broadcast %60 : vector<1x64xf32> to vector<8x64xf32>
    %104 = arith.addf %102, %103 : vector<8x64xf32>
    %105 = vector.extract_strided_slice %34 {offsets = [8, 0], sizes = [8, 64], strides = [1, 1]} : vector<64x64xf32> to vector<8x64xf32>
    %106 = arith.addf %105, %98 : vector<8x64xf32>
    %107 = arith.negf %106 : vector<8x64xf32>
    %108 = math.exp %107 : vector<8x64xf32>
    %cst_65 = arith.constant 1.000000e+00 : f32
    %109 = vector.broadcast %cst_65 : f32 to vector<8x64xf32>
    %110 = arith.addf %109, %108 : vector<8x64xf32>
    %111 = arith.divf %109, %110 : vector<8x64xf32>
    %112 = vector.extract_strided_slice %41 {offsets = [8, 0], sizes = [8, 64], strides = [1, 1]} : vector<64x64xf32> to vector<8x64xf32>
    %113 = arith.addf %112, %101 : vector<8x64xf32>
    %114 = arith.negf %113 : vector<8x64xf32>
    %115 = math.exp %114 : vector<8x64xf32>
    %cst_66 = arith.constant 1.000000e+00 : f32
    %116 = vector.broadcast %cst_66 : f32 to vector<8x64xf32>
    %117 = arith.addf %116, %115 : vector<8x64xf32>
    %118 = arith.divf %116, %117 : vector<8x64xf32>
    %119 = vector.extract_strided_slice %48 {offsets = [8, 0], sizes = [8, 64], strides = [1, 1]} : vector<64x64xf32> to vector<8x64xf32>
    %120 = arith.mulf %111, %104 : vector<8x64xf32>
    %121 = arith.addf %119, %120 : vector<8x64xf32>
    %122 = math.tanh %121 : vector<8x64xf32>
    %cst_67 = arith.constant 1.000000e+00 : f32
    %123 = vector.broadcast %cst_67 : f32 to vector<8x64xf32>
    %124 = arith.subf %123, %118 : vector<8x64xf32>
    %125 = arith.mulf %124, %122 : vector<8x64xf32>
    %126 = arith.mulf %118, %94 : vector<8x64xf32>
    %127 = arith.addf %125, %126 : vector<8x64xf32>
    %128 = arith.truncf %127 : vector<8x64xf32> to vector<8x64xbf16>
    %cst_68 = arith.constant dense<0.000000e+00> : vector<8x64xf32>
    %129 = tpu.matmul %128, %50, %cst_68 {dimension_numbers = #tpu.dot_dimension_numbers<[1], [0], [0], [1], [0, 0, 1, 1], [], []>} : vector<8x64xbf16>, vector<64x64xbf16>, vector<8x64xf32> -> vector<8x64xf32>
    %130 = vector.broadcast %56 : vector<1x64xf32> to vector<8x64xf32>
    %131 = arith.addf %129, %130 : vector<8x64xf32>
    %cst_69 = arith.constant dense<0.000000e+00> : vector<8x64xf32>
    %132 = tpu.matmul %128, %52, %cst_69 {dimension_numbers = #tpu.dot_dimension_numbers<[1], [0], [0], [1], [0, 0, 1, 1], [], []>} : vector<8x64xbf16>, vector<64x64xbf16>, vector<8x64xf32> -> vector<8x64xf32>
    %133 = vector.broadcast %58 : vector<1x64xf32> to vector<8x64xf32>
    %134 = arith.addf %132, %133 : vector<8x64xf32>
    %cst_70 = arith.constant dense<0.000000e+00> : vector<8x64xf32>
    %135 = tpu.matmul %128, %54, %cst_70 {dimension_numbers = #tpu.dot_dimension_numbers<[1], [0], [0], [1], [0, 0, 1, 1], [], []>} : vector<8x64xbf16>, vector<64x64xbf16>, vector<8x64xf32> -> vector<8x64xf32>
    %136 = vector.broadcast %60 : vector<1x64xf32> to vector<8x64xf32>
    %137 = arith.addf %135, %136 : vector<8x64xf32>
    %138 = vector.extract_strided_slice %34 {offsets = [16, 0], sizes = [8, 64], strides = [1, 1]} : vector<64x64xf32> to vector<8x64xf32>
    %139 = arith.addf %138, %131 : vector<8x64xf32>
    %140 = arith.negf %139 : vector<8x64xf32>
    %141 = math.exp %140 : vector<8x64xf32>
    %cst_71 = arith.constant 1.000000e+00 : f32
    %142 = vector.broadcast %cst_71 : f32 to vector<8x64xf32>
    %143 = arith.addf %142, %141 : vector<8x64xf32>
    %144 = arith.divf %142, %143 : vector<8x64xf32>
    %145 = vector.extract_strided_slice %41 {offsets = [16, 0], sizes = [8, 64], strides = [1, 1]} : vector<64x64xf32> to vector<8x64xf32>
    %146 = arith.addf %145, %134 : vector<8x64xf32>
    %147 = arith.negf %146 : vector<8x64xf32>
    %148 = math.exp %147 : vector<8x64xf32>
    %cst_72 = arith.constant 1.000000e+00 : f32
    %149 = vector.broadcast %cst_72 : f32 to vector<8x64xf32>
    %150 = arith.addf %149, %148 : vector<8x64xf32>
    %151 = arith.divf %149, %150 : vector<8x64xf32>
    %152 = vector.extract_strided_slice %48 {offsets = [16, 0], sizes = [8, 64], strides = [1, 1]} : vector<64x64xf32> to vector<8x64xf32>
    %153 = arith.mulf %144, %137 : vector<8x64xf32>
    %154 = arith.addf %152, %153 : vector<8x64xf32>
    %155 = math.tanh %154 : vector<8x64xf32>
    %cst_73 = arith.constant 1.000000e+00 : f32
    %156 = vector.broadcast %cst_73 : f32 to vector<8x64xf32>
    %157 = arith.subf %156, %151 : vector<8x64xf32>
    %158 = arith.mulf %157, %155 : vector<8x64xf32>
    %159 = arith.mulf %151, %127 : vector<8x64xf32>
    %160 = arith.addf %158, %159 : vector<8x64xf32>
    %161 = arith.truncf %160 : vector<8x64xf32> to vector<8x64xbf16>
    %cst_74 = arith.constant dense<0.000000e+00> : vector<8x64xf32>
    %162 = tpu.matmul %161, %50, %cst_74 {dimension_numbers = #tpu.dot_dimension_numbers<[1], [0], [0], [1], [0, 0, 1, 1], [], []>} : vector<8x64xbf16>, vector<64x64xbf16>, vector<8x64xf32> -> vector<8x64xf32>
    %163 = vector.broadcast %56 : vector<1x64xf32> to vector<8x64xf32>
    %164 = arith.addf %162, %163 : vector<8x64xf32>
    %cst_75 = arith.constant dense<0.000000e+00> : vector<8x64xf32>
    %165 = tpu.matmul %161, %52, %cst_75 {dimension_numbers = #tpu.dot_dimension_numbers<[1], [0], [0], [1], [0, 0, 1, 1], [], []>} : vector<8x64xbf16>, vector<64x64xbf16>, vector<8x64xf32> -> vector<8x64xf32>
    %166 = vector.broadcast %58 : vector<1x64xf32> to vector<8x64xf32>
    %167 = arith.addf %165, %166 : vector<8x64xf32>
    %cst_76 = arith.constant dense<0.000000e+00> : vector<8x64xf32>
    %168 = tpu.matmul %161, %54, %cst_76 {dimension_numbers = #tpu.dot_dimension_numbers<[1], [0], [0], [1], [0, 0, 1, 1], [], []>} : vector<8x64xbf16>, vector<64x64xbf16>, vector<8x64xf32> -> vector<8x64xf32>
    %169 = vector.broadcast %60 : vector<1x64xf32> to vector<8x64xf32>
    %170 = arith.addf %168, %169 : vector<8x64xf32>
    %171 = vector.extract_strided_slice %34 {offsets = [24, 0], sizes = [8, 64], strides = [1, 1]} : vector<64x64xf32> to vector<8x64xf32>
    %172 = arith.addf %171, %164 : vector<8x64xf32>
    %173 = arith.negf %172 : vector<8x64xf32>
    %174 = math.exp %173 : vector<8x64xf32>
    %cst_77 = arith.constant 1.000000e+00 : f32
    %175 = vector.broadcast %cst_77 : f32 to vector<8x64xf32>
    %176 = arith.addf %175, %174 : vector<8x64xf32>
    %177 = arith.divf %175, %176 : vector<8x64xf32>
    %178 = vector.extract_strided_slice %41 {offsets = [24, 0], sizes = [8, 64], strides = [1, 1]} : vector<64x64xf32> to vector<8x64xf32>
    %179 = arith.addf %178, %167 : vector<8x64xf32>
    %180 = arith.negf %179 : vector<8x64xf32>
    %181 = math.exp %180 : vector<8x64xf32>
    %cst_78 = arith.constant 1.000000e+00 : f32
    %182 = vector.broadcast %cst_78 : f32 to vector<8x64xf32>
    %183 = arith.addf %182, %181 : vector<8x64xf32>
    %184 = arith.divf %182, %183 : vector<8x64xf32>
    %185 = vector.extract_strided_slice %48 {offsets = [24, 0], sizes = [8, 64], strides = [1, 1]} : vector<64x64xf32> to vector<8x64xf32>
    %186 = arith.mulf %177, %170 : vector<8x64xf32>
    %187 = arith.addf %185, %186 : vector<8x64xf32>
    %188 = math.tanh %187 : vector<8x64xf32>
    %cst_79 = arith.constant 1.000000e+00 : f32
    %189 = vector.broadcast %cst_79 : f32 to vector<8x64xf32>
    %190 = arith.subf %189, %184 : vector<8x64xf32>
    %191 = arith.mulf %190, %188 : vector<8x64xf32>
    %192 = arith.mulf %184, %160 : vector<8x64xf32>
    %193 = arith.addf %191, %192 : vector<8x64xf32>
    %194 = arith.truncf %193 : vector<8x64xf32> to vector<8x64xbf16>
    %cst_80 = arith.constant dense<0.000000e+00> : vector<8x64xf32>
    %195 = tpu.matmul %194, %50, %cst_80 {dimension_numbers = #tpu.dot_dimension_numbers<[1], [0], [0], [1], [0, 0, 1, 1], [], []>} : vector<8x64xbf16>, vector<64x64xbf16>, vector<8x64xf32> -> vector<8x64xf32>
    %196 = vector.broadcast %56 : vector<1x64xf32> to vector<8x64xf32>
    %197 = arith.addf %195, %196 : vector<8x64xf32>
    %cst_81 = arith.constant dense<0.000000e+00> : vector<8x64xf32>
    %198 = tpu.matmul %194, %52, %cst_81 {dimension_numbers = #tpu.dot_dimension_numbers<[1], [0], [0], [1], [0, 0, 1, 1], [], []>} : vector<8x64xbf16>, vector<64x64xbf16>, vector<8x64xf32> -> vector<8x64xf32>
    %199 = vector.broadcast %58 : vector<1x64xf32> to vector<8x64xf32>
    %200 = arith.addf %198, %199 : vector<8x64xf32>
    %cst_82 = arith.constant dense<0.000000e+00> : vector<8x64xf32>
    %201 = tpu.matmul %194, %54, %cst_82 {dimension_numbers = #tpu.dot_dimension_numbers<[1], [0], [0], [1], [0, 0, 1, 1], [], []>} : vector<8x64xbf16>, vector<64x64xbf16>, vector<8x64xf32> -> vector<8x64xf32>
    %202 = vector.broadcast %60 : vector<1x64xf32> to vector<8x64xf32>
    %203 = arith.addf %201, %202 : vector<8x64xf32>
    %204 = vector.extract_strided_slice %34 {offsets = [32, 0], sizes = [8, 64], strides = [1, 1]} : vector<64x64xf32> to vector<8x64xf32>
    %205 = arith.addf %204, %197 : vector<8x64xf32>
    %206 = arith.negf %205 : vector<8x64xf32>
    %207 = math.exp %206 : vector<8x64xf32>
    %cst_83 = arith.constant 1.000000e+00 : f32
    %208 = vector.broadcast %cst_83 : f32 to vector<8x64xf32>
    %209 = arith.addf %208, %207 : vector<8x64xf32>
    %210 = arith.divf %208, %209 : vector<8x64xf32>
    %211 = vector.extract_strided_slice %41 {offsets = [32, 0], sizes = [8, 64], strides = [1, 1]} : vector<64x64xf32> to vector<8x64xf32>
    %212 = arith.addf %211, %200 : vector<8x64xf32>
    %213 = arith.negf %212 : vector<8x64xf32>
    %214 = math.exp %213 : vector<8x64xf32>
    %cst_84 = arith.constant 1.000000e+00 : f32
    %215 = vector.broadcast %cst_84 : f32 to vector<8x64xf32>
    %216 = arith.addf %215, %214 : vector<8x64xf32>
    %217 = arith.divf %215, %216 : vector<8x64xf32>
    %218 = vector.extract_strided_slice %48 {offsets = [32, 0], sizes = [8, 64], strides = [1, 1]} : vector<64x64xf32> to vector<8x64xf32>
    %219 = arith.mulf %210, %203 : vector<8x64xf32>
    %220 = arith.addf %218, %219 : vector<8x64xf32>
    %221 = math.tanh %220 : vector<8x64xf32>
    %cst_85 = arith.constant 1.000000e+00 : f32
    %222 = vector.broadcast %cst_85 : f32 to vector<8x64xf32>
    %223 = arith.subf %222, %217 : vector<8x64xf32>
    %224 = arith.mulf %223, %221 : vector<8x64xf32>
    %225 = arith.mulf %217, %193 : vector<8x64xf32>
    %226 = arith.addf %224, %225 : vector<8x64xf32>
    %227 = arith.truncf %226 : vector<8x64xf32> to vector<8x64xbf16>
    %cst_86 = arith.constant dense<0.000000e+00> : vector<8x64xf32>
    %228 = tpu.matmul %227, %50, %cst_86 {dimension_numbers = #tpu.dot_dimension_numbers<[1], [0], [0], [1], [0, 0, 1, 1], [], []>} : vector<8x64xbf16>, vector<64x64xbf16>, vector<8x64xf32> -> vector<8x64xf32>
    %229 = vector.broadcast %56 : vector<1x64xf32> to vector<8x64xf32>
    %230 = arith.addf %228, %229 : vector<8x64xf32>
    %cst_87 = arith.constant dense<0.000000e+00> : vector<8x64xf32>
    %231 = tpu.matmul %227, %52, %cst_87 {dimension_numbers = #tpu.dot_dimension_numbers<[1], [0], [0], [1], [0, 0, 1, 1], [], []>} : vector<8x64xbf16>, vector<64x64xbf16>, vector<8x64xf32> -> vector<8x64xf32>
    %232 = vector.broadcast %58 : vector<1x64xf32> to vector<8x64xf32>
    %233 = arith.addf %231, %232 : vector<8x64xf32>
    %cst_88 = arith.constant dense<0.000000e+00> : vector<8x64xf32>
    %234 = tpu.matmul %227, %54, %cst_88 {dimension_numbers = #tpu.dot_dimension_numbers<[1], [0], [0], [1], [0, 0, 1, 1], [], []>} : vector<8x64xbf16>, vector<64x64xbf16>, vector<8x64xf32> -> vector<8x64xf32>
    %235 = vector.broadcast %60 : vector<1x64xf32> to vector<8x64xf32>
    %236 = arith.addf %234, %235 : vector<8x64xf32>
    %237 = vector.extract_strided_slice %34 {offsets = [40, 0], sizes = [8, 64], strides = [1, 1]} : vector<64x64xf32> to vector<8x64xf32>
    %238 = arith.addf %237, %230 : vector<8x64xf32>
    %239 = arith.negf %238 : vector<8x64xf32>
    %240 = math.exp %239 : vector<8x64xf32>
    %cst_89 = arith.constant 1.000000e+00 : f32
    %241 = vector.broadcast %cst_89 : f32 to vector<8x64xf32>
    %242 = arith.addf %241, %240 : vector<8x64xf32>
    %243 = arith.divf %241, %242 : vector<8x64xf32>
    %244 = vector.extract_strided_slice %41 {offsets = [40, 0], sizes = [8, 64], strides = [1, 1]} : vector<64x64xf32> to vector<8x64xf32>
    %245 = arith.addf %244, %233 : vector<8x64xf32>
    %246 = arith.negf %245 : vector<8x64xf32>
    %247 = math.exp %246 : vector<8x64xf32>
    %cst_90 = arith.constant 1.000000e+00 : f32
    %248 = vector.broadcast %cst_90 : f32 to vector<8x64xf32>
    %249 = arith.addf %248, %247 : vector<8x64xf32>
    %250 = arith.divf %248, %249 : vector<8x64xf32>
    %251 = vector.extract_strided_slice %48 {offsets = [40, 0], sizes = [8, 64], strides = [1, 1]} : vector<64x64xf32> to vector<8x64xf32>
    %252 = arith.mulf %243, %236 : vector<8x64xf32>
    %253 = arith.addf %251, %252 : vector<8x64xf32>
    %254 = math.tanh %253 : vector<8x64xf32>
    %cst_91 = arith.constant 1.000000e+00 : f32
    %255 = vector.broadcast %cst_91 : f32 to vector<8x64xf32>
    %256 = arith.subf %255, %250 : vector<8x64xf32>
    %257 = arith.mulf %256, %254 : vector<8x64xf32>
    %258 = arith.mulf %250, %226 : vector<8x64xf32>
    %259 = arith.addf %257, %258 : vector<8x64xf32>
    %260 = arith.truncf %259 : vector<8x64xf32> to vector<8x64xbf16>
    %cst_92 = arith.constant dense<0.000000e+00> : vector<8x64xf32>
    %261 = tpu.matmul %260, %50, %cst_92 {dimension_numbers = #tpu.dot_dimension_numbers<[1], [0], [0], [1], [0, 0, 1, 1], [], []>} : vector<8x64xbf16>, vector<64x64xbf16>, vector<8x64xf32> -> vector<8x64xf32>
    %262 = vector.broadcast %56 : vector<1x64xf32> to vector<8x64xf32>
    %263 = arith.addf %261, %262 : vector<8x64xf32>
    %cst_93 = arith.constant dense<0.000000e+00> : vector<8x64xf32>
    %264 = tpu.matmul %260, %52, %cst_93 {dimension_numbers = #tpu.dot_dimension_numbers<[1], [0], [0], [1], [0, 0, 1, 1], [], []>} : vector<8x64xbf16>, vector<64x64xbf16>, vector<8x64xf32> -> vector<8x64xf32>
    %265 = vector.broadcast %58 : vector<1x64xf32> to vector<8x64xf32>
    %266 = arith.addf %264, %265 : vector<8x64xf32>
    %cst_94 = arith.constant dense<0.000000e+00> : vector<8x64xf32>
    %267 = tpu.matmul %260, %54, %cst_94 {dimension_numbers = #tpu.dot_dimension_numbers<[1], [0], [0], [1], [0, 0, 1, 1], [], []>} : vector<8x64xbf16>, vector<64x64xbf16>, vector<8x64xf32> -> vector<8x64xf32>
    %268 = vector.broadcast %60 : vector<1x64xf32> to vector<8x64xf32>
    %269 = arith.addf %267, %268 : vector<8x64xf32>
    %270 = vector.extract_strided_slice %34 {offsets = [48, 0], sizes = [8, 64], strides = [1, 1]} : vector<64x64xf32> to vector<8x64xf32>
    %271 = arith.addf %270, %263 : vector<8x64xf32>
    %272 = arith.negf %271 : vector<8x64xf32>
    %273 = math.exp %272 : vector<8x64xf32>
    %cst_95 = arith.constant 1.000000e+00 : f32
    %274 = vector.broadcast %cst_95 : f32 to vector<8x64xf32>
    %275 = arith.addf %274, %273 : vector<8x64xf32>
    %276 = arith.divf %274, %275 : vector<8x64xf32>
    %277 = vector.extract_strided_slice %41 {offsets = [48, 0], sizes = [8, 64], strides = [1, 1]} : vector<64x64xf32> to vector<8x64xf32>
    %278 = arith.addf %277, %266 : vector<8x64xf32>
    %279 = arith.negf %278 : vector<8x64xf32>
    %280 = math.exp %279 : vector<8x64xf32>
    %cst_96 = arith.constant 1.000000e+00 : f32
    %281 = vector.broadcast %cst_96 : f32 to vector<8x64xf32>
    %282 = arith.addf %281, %280 : vector<8x64xf32>
    %283 = arith.divf %281, %282 : vector<8x64xf32>
    %284 = vector.extract_strided_slice %48 {offsets = [48, 0], sizes = [8, 64], strides = [1, 1]} : vector<64x64xf32> to vector<8x64xf32>
    %285 = arith.mulf %276, %269 : vector<8x64xf32>
    %286 = arith.addf %284, %285 : vector<8x64xf32>
    %287 = math.tanh %286 : vector<8x64xf32>
    %cst_97 = arith.constant 1.000000e+00 : f32
    %288 = vector.broadcast %cst_97 : f32 to vector<8x64xf32>
    %289 = arith.subf %288, %283 : vector<8x64xf32>
    %290 = arith.mulf %289, %287 : vector<8x64xf32>
    %291 = arith.mulf %283, %259 : vector<8x64xf32>
    %292 = arith.addf %290, %291 : vector<8x64xf32>
    %293 = arith.truncf %292 : vector<8x64xf32> to vector<8x64xbf16>
    %cst_98 = arith.constant dense<0.000000e+00> : vector<8x64xf32>
    %294 = tpu.matmul %293, %50, %cst_98 {dimension_numbers = #tpu.dot_dimension_numbers<[1], [0], [0], [1], [0, 0, 1, 1], [], []>} : vector<8x64xbf16>, vector<64x64xbf16>, vector<8x64xf32> -> vector<8x64xf32>
    %295 = vector.broadcast %56 : vector<1x64xf32> to vector<8x64xf32>
    %296 = arith.addf %294, %295 : vector<8x64xf32>
    %cst_99 = arith.constant dense<0.000000e+00> : vector<8x64xf32>
    %297 = tpu.matmul %293, %52, %cst_99 {dimension_numbers = #tpu.dot_dimension_numbers<[1], [0], [0], [1], [0, 0, 1, 1], [], []>} : vector<8x64xbf16>, vector<64x64xbf16>, vector<8x64xf32> -> vector<8x64xf32>
    %298 = vector.broadcast %58 : vector<1x64xf32> to vector<8x64xf32>
    %299 = arith.addf %297, %298 : vector<8x64xf32>
    %cst_100 = arith.constant dense<0.000000e+00> : vector<8x64xf32>
    %300 = tpu.matmul %293, %54, %cst_100 {dimension_numbers = #tpu.dot_dimension_numbers<[1], [0], [0], [1], [0, 0, 1, 1], [], []>} : vector<8x64xbf16>, vector<64x64xbf16>, vector<8x64xf32> -> vector<8x64xf32>
    %301 = vector.broadcast %60 : vector<1x64xf32> to vector<8x64xf32>
    %302 = arith.addf %300, %301 : vector<8x64xf32>
    %303 = vector.extract_strided_slice %34 {offsets = [56, 0], sizes = [8, 64], strides = [1, 1]} : vector<64x64xf32> to vector<8x64xf32>
    %304 = arith.addf %303, %296 : vector<8x64xf32>
    %305 = arith.negf %304 : vector<8x64xf32>
    %306 = math.exp %305 : vector<8x64xf32>
    %cst_101 = arith.constant 1.000000e+00 : f32
    %307 = vector.broadcast %cst_101 : f32 to vector<8x64xf32>
    %308 = arith.addf %307, %306 : vector<8x64xf32>
    %309 = arith.divf %307, %308 : vector<8x64xf32>
    %310 = vector.extract_strided_slice %41 {offsets = [56, 0], sizes = [8, 64], strides = [1, 1]} : vector<64x64xf32> to vector<8x64xf32>
    %311 = arith.addf %310, %299 : vector<8x64xf32>
    %312 = arith.negf %311 : vector<8x64xf32>
    %313 = math.exp %312 : vector<8x64xf32>
    %cst_102 = arith.constant 1.000000e+00 : f32
    %314 = vector.broadcast %cst_102 : f32 to vector<8x64xf32>
    %315 = arith.addf %314, %313 : vector<8x64xf32>
    %316 = arith.divf %314, %315 : vector<8x64xf32>
    %317 = vector.extract_strided_slice %48 {offsets = [56, 0], sizes = [8, 64], strides = [1, 1]} : vector<64x64xf32> to vector<8x64xf32>
    %318 = arith.mulf %309, %302 : vector<8x64xf32>
    %319 = arith.addf %317, %318 : vector<8x64xf32>
    %320 = math.tanh %319 : vector<8x64xf32>
    %cst_103 = arith.constant 1.000000e+00 : f32
    %321 = vector.broadcast %cst_103 : f32 to vector<8x64xf32>
    %322 = arith.subf %321, %316 : vector<8x64xf32>
    %323 = arith.mulf %322, %320 : vector<8x64xf32>
    %324 = arith.mulf %316, %292 : vector<8x64xf32>
    %325 = arith.addf %323, %324 : vector<8x64xf32>
    %c0_104 = arith.constant 0 : index
    %c0_105 = arith.constant 0 : index
    %326 = vector.load %arg7[%c0_104, %c0_105] : memref<8x64xf32, #tpu.memory_space<vmem>>, vector<8x64xf32>
    tpu.vector_store %arg7[%c0_104, %c0_105], %325 {strides = array<i32>} : memref<8x64xf32, #tpu.memory_space<vmem>>, vector<8x64xf32>,
    return
  }
}

</mosaic_0001>

<bundles_post_ra>
// kernel: st_encoder_forward.1
= control target key start
LH: loop header
LB: loop body
LE: loop exit
PB: predicated region body
PF: predicated region fallthrough
CT: control target
= control target key end

     0   :  { %vm63_vm0 = vcmask 1041408   ;;  %vm38_vm1 = vcmask 15360   ;;  %v1481_v5 = vmov 0.0   ;;  %v1482_v19 = vmov 0   ;;  %s1987_s1 = inlined_call_operand.vmem [shape: f32[3,2,16], index: 1, kind: input, shape index: {}]   ;;  %s1988_s0 = inlined_call_operand.vmem [shape: f32[8,8,2], index: 0, kind: input, shape index: {}]   ;;  %s1989_s2 = inlined_call_operand.vmem [shape: f32[1,16], index: 2, kind: input, shape index: {}]   ;;  %s1990_s5 = inlined_call_operand.vmem [shape: f32[3,1,64], index: 5, kind: input, shape index: {}]   ;;  %s1991_s4 = inlined_call_operand.vmem [shape: bf16[3,64,64], index: 4, kind: input, shape index: {}]   ;;  %s1992_s3 = inlined_call_operand.vmem [shape: bf16[3,16,64], index: 3, kind: input, shape index: {}]   ;;  %s1993_s6 = inlined_call_operand.vmem [shape: f32[3,1,64], index: 6, kind: input, shape index: {}]   ;;  %s1994_s7 = inlined_call_operand.vmem [shape: f32[8,64], index: 7, kind: output, shape index: {}]  }
   0x1   :  { %v1228_v0 = vld [vmem:[%s1987_s1 + $0x4] sm:$0x3]  ;;  %v28_v1 = vld [vmem:[%s1988_s0 + $0x8] sm:$0xff]  ;;  %v1210_v2 = vld [vmem:[%s1987_s1 + $0x2] sm:$0x3]  ;;  %vm245_vm2 = vcmask 130048  }
   0x2   :  { %1229 = vmatpush.msk.msra.mxu2 %vm63_vm0, %v1228_v0  ;;  %1211 = vmatpush.msk.msra.mxu0 %vm63_vm0, %v1210_v2  ;;  %v35_v3 = vld [vmem:[%s1987_s1] sm:$0x3]  ;;  %v29_v6 = vld [vmem:[%s1988_s0 + $0x10] sm:$0xff]  ;;  %v30_v7 = vld [vmem:[%s1988_s0 + $0x18] sm:$0xff]  ;;  %vm431_vm11 = vcmask 523264  }
   0x3   :  { %v27_v4 = vld [vmem:[%s1988_s0] sm:$0xff]  ;;  %1230 = vmatmul.msk.f32.vlgmr.msra.gmra.mxu2 %vm38_vm1, %v28_v1  ;;  %1220 = vmatpush.msk.msra.mxu1 %vm63_vm0, %v35_v3  ;;  %v32_v9 = vld [vmem:[%s1988_s0 + $0x28] sm:$0xff]  ;;  %v33_v10 = vld [vmem:[%s1988_s0 + $0x30] sm:$0xff] }
   0x4   :  { %1212 = vmatmul.msk.f32.vlgmr.msra.gmra.mxu0 %vm38_vm1, %v27_v4  ;;  %130 = vmatmul.f32.vlgmr.msra.gmra.mxu1 %v1481_v5  ;;  %v31_v8 = vld [vmem:[%s1988_s0 + $0x20] sm:$0xff]  ;;  %v34_v11 = vld [vmem:[%s1988_s0 + $0x38] sm:$0xff]  ;;  %v1587_v13 = vld [vmem:[%s1991_s4 + $0x10] sm:$0xff] }
   0x5   :  { %v1581_v12 = vld [vmem:[%s1991_s4 + $0x18] sm:$0xff]  ;;  %v1593_v14 = vld [vmem:[%s1991_s4 + $0x8] sm:$0xff]  ;;  %v1370_v15 = vld [vmem:[%s1992_s3] sm:$0xff] }
   0x6   :  { %439 = vmatpush.bf16.msrb.mxu2 %v1581_v12  ;;  %v1371_v16 = vld [vmem:[%s1992_s3 + $0x8] sm:$0xff]  ;;  %v1372_v17 = vld [vmem:[%s1992_s3 + $0x10] sm:$0xff]  ;;  %v1608_v18 = vld [vmem:[%s1991_s4] sm:$0xff]  ;;  %265 = vmatpush.bf16.msra.mxu3 %v1370_v15 }
   0x7   :  { %308 = vmatpush.bf16.msrb.mxu0 %v1371_v16  ;;  %351 = vmatpush.bf16.msrb.mxu1 %v1372_v17  ;;  %v1617_v20 = vld [vmem:[%s1991_s4 + $0x38] sm:$0xff]  ;;  %v1632_v28 = vld [vmem:[%s1991_s4 + $0x50] sm:$0xff]  ;;  %v1637_v30 = vld [vmem:[%s1989_s2] ss:$0 sm:$0xff] }
   0x8   :  { %v1625_v23 = vld [vmem:[%s1991_s4 + $0x58] sm:$0xff]  ;;  %v1642_v32 = vld [vmem:[%s1991_s4 + $0x30] sm:$0xff]  ;;  %v1650_v33 = vld [vmem:[%s1991_s4 + $0x48] sm:$0xff] }
   0x9   :  { %v1659_v40 = vld [vmem:[%s1991_s4 + $0x40] sm:$0xff]  ;;  %v1674_v50 = vld [vmem:[%s1991_s4 + $0x28] sm:$0xff] }
   0xa   :  { %440 = vmatpush.bf16.msrb.mxu2 %v1587_v13  ;;  %479 = vmatpush.bf16.msrb.mxu3 %v1617_v20  ;;  %v1691_v62 = vld [vmem:[%s1991_s4 + $0x20] sm:$0xff] }
   0xb   :  { %1231 = vmatmul.msk.f32.gmra.mxu2 %vm38_vm1, %v29_v6  ;;  %763 = vmatpush.bf16.msra.mxu1 %v1581_v12 }
   0xc   :  { %1213 = vmatmul.msk.f32.gmra.mxu0 %vm38_vm1, %v28_v1  ;;  %1221 = vmatmul.msk.f32.gmra.mxu1 %vm38_vm1, %v27_v4 }
   0xd   :  { %699 = vmatpush.bf16.msra.mxu0 %v1625_v23 }
   0xe   :  { %441 = vmatpush.bf16.msrb.mxu2 %v1593_v14  ;;  %480 = vmatpush.bf16.msrb.mxu3 %v1642_v32 }
   0xf   :  { %764 = vmatpush.bf16.msra.mxu1 %v1587_v13 }
  0x11   :  { %700 = vmatpush.bf16.msra.mxu0 %v1632_v28 }
  0x12   :  { %442 = vmatpush.bf16.msrb.mxu2 %v1608_v18  ;;  %481 = vmatpush.bf16.msrb.mxu3 %v1674_v50 }
  0x13   :  { %1232 = vmatmul.msk.f32.gmra.mxu2 %vm38_vm1, %v30_v7  ;;  %765 = vmatpush.bf16.msra.mxu1 %v1593_v14 }
  0x14   :  { %1214 = vmatmul.msk.f32.gmra.mxu0 %vm38_vm1, %v29_v6  ;;  %1222 = vmatmul.msk.f32.gmra.mxu1 %vm38_vm1, %v28_v1 }
  0x15   :  { %701 = vmatpush.bf16.msra.mxu0 %v1650_v33 }
  0x16   :  { %519 = vmatpush.bf16.msra.mxu2 %v1625_v23  ;;  %482 = vmatpush.bf16.msrb.mxu3 %v1691_v62 }
  0x17   :  { %766 = vmatpush.bf16.msra.mxu1 %v1608_v18 }
  0x19   :  { %702 = vmatpush.bf16.msra.mxu0 %v1659_v40 }
  0x1a   :  { %520 = vmatpush.bf16.msra.mxu2 %v1632_v28 }
  0x1b   :  { %1233 = vmatmul.msk.f32.gmra.mxu2 %vm38_vm1, %v31_v8 }
  0x1c   :  { %1215 = vmatmul.msk.f32.gmra.mxu0 %vm38_vm1, %v30_v7  ;;  %1223 = vmatmul.msk.f32.gmra.mxu1 %vm38_vm1, %v29_v6 }
  0x1e   :  { %521 = vmatpush.bf16.msra.mxu2 %v1650_v33 }
  0x22   :  { %522 = vmatpush.bf16.msra.mxu2 %v1659_v40 }
  0x23   :  { %1234 = vmatmul.msk.f32.gmra.mxu2 %vm38_vm1, %v32_v9 }
  0x24   :  { %1216 = vmatmul.msk.f32.gmra.mxu0 %vm38_vm1, %v31_v8  ;;  %1224 = vmatmul.msk.f32.gmra.mxu1 %vm38_vm1, %v30_v7 }
  0x2b   :  { %1235 = vmatmul.msk.f32.gmra.mxu2 %vm38_vm1, %v33_v10 }
  0x2c   :  { %1217 = vmatmul.msk.f32.gmra.mxu0 %vm38_vm1, %v32_v9  ;;  %1225 = vmatmul.msk.f32.gmra.mxu1 %vm38_vm1, %v31_v8 }
  0x33   :  { %1236 = vmatmul.msk.f32.gmra.mxu2 %vm38_vm1, %v34_v11 }
  0x34   :  { %1218 = vmatmul.msk.f32.gmra.mxu0 %vm38_vm1, %v33_v10  ;;  %1226 = vmatmul.msk.f32.gmra.mxu1 %vm38_vm1, %v32_v9 }
  0x3b   :  { %197 = vmatmul.f32.gmra.mxu2 %v1481_v5 }
  0x3c   :  { %1219 = vmatmul.msk.f32.gmra.mxu0 %vm38_vm1, %v34_v11  ;;  %1227 = vmatmul.msk.f32.gmra.mxu1 %vm38_vm1, %v33_v10 }
  0x43   :  { %443 = vmatmul.bf16.vlgmr.msrb.gmra.mxu2 %v1482_v19 }
  0x44   :  { %596 = vmatpush.bf16.msrb.mxu2 %v1617_v20 }
  0x48   :  { %597 = vmatpush.bf16.msrb.mxu2 %v1642_v32 }
  0x4c   :  { %598 = vmatpush.bf16.msrb.mxu2 %v1674_v50 }
  0x50   :  { %599 = vmatpush.bf16.msrb.mxu2 %v1691_v62 }
  0x53   :  { %523 = vmatmul.bf16.vlgmr.msra.gmra.mxu2 %v1482_v19 }
  0x54   :  { %673 = vmatpush.bf16.msra.mxu2 %v1581_v12 }
  0x58   :  { %674 = vmatpush.bf16.msra.mxu2 %v1587_v13 }
  0x5c   :  { %675 = vmatpush.bf16.msra.mxu2 %v1593_v14 }
  0x60   :  { %676 = vmatpush.bf16.msra.mxu2 %v1608_v18 }
  0x81   :  { %v84_v21 = vpop.f32.mrf.mxu0  ;;  %v131_v22 = vpop.f32.mrf.mxu1 }
  0x82   :  { %v132_v25 = vadd.f32 %v131_v22, %v84_v21 }
  0x86   :  { %v177_v24 = vpop.f32.mrf.mxu2 }
  0x87   :  { %v201_v29 = vadd.f32 %v177_v24, %v132_v25 }
  0x89   :  { %v87_v26 = vpop.f32.mrf.mxu0  ;;  %v134_v27 = vpop.f32.mrf.mxu1  ;;  %v213_v35 = vadd.f32 %v1637_v30, %v201_v29 }
  0x8a   :  { %v135_v31 = vadd.f32 %v134_v27, %v87_v26 }
  0x8b   :  { %v221_v41 = vmax.f32 %v213_v35, 0.0 }
  0x8e   :  { %v180_v34 = vpop.f32.mrf.mxu2 }
  0x8f   :  { %v202_v36 = vadd.f32 %v180_v34, %v135_v31 }
  0x91   :  { %v214_v37 = vadd.f32 %v1637_v30, %v202_v36  ;;  %v90_v38 = vpop.f32.mrf.mxu0  ;;  %v137_v39 = vpop.f32.mrf.mxu1 }
  0x92   :  { %v138_v45 = vadd.f32 %v137_v39, %v90_v38  ;;  %v1726_v39 = vld [vmem:[%s1993_s6] ss:$0 sm:$0xff] }
  0x93   :  { %v222_v42 = vmax.f32 %v214_v37, 0.0 }
  0x95   :  { %v229_v43 = vpack.c.bf16 %v222_v42, %v221_v41 }
  0x96   :  { %v183_v44 = vpop.f32.mrf.mxu2 }
  0x97   :  { %1241 = vmatmul.msk.bf16.vlgmr.msra.gmra.mxu3 %vm245_vm2, %v229_v43  ;;  %1252 = vmatmul.msk.bf16.vlgmr.msrb.gmra.mxu0 %vm245_vm2, %v229_v43  ;;  %v203_v48 = vadd.f32 %v183_v44, %v138_v45 }
  0x98   :  { %1263 = vmatmul.msk.bf16.vlgmr.msrb.gmra.mxu1 %vm245_vm2, %v229_v43  ;;  %853 = vmatpush.bf16.msrb.mxu0 %v1581_v12 }
  0x99   :  { %v93_v46 = vpop.f32.mrf.mxu0  ;;  %v140_v47 = vpop.f32.mrf.mxu1  ;;  %866 = vmatpush.bf16.msrb.mxu1 %v1617_v20  ;;  %v215_v52 = vadd.f32 %v1637_v30, %v203_v48  ;;  %583 = vmatpush.bf16.msra.mxu3 %v1581_v12 }
  0x9a   :  { %v141_v49 = vadd.f32 %v140_v47, %v93_v46 }
  0x9b   :  { %v223_v57 = vmax.f32 %v215_v52, 0.0 }
  0x9c   :  { %854 = vmatpush.bf16.msrb.mxu0 %v1587_v13 }
  0x9d   :  { %867 = vmatpush.bf16.msrb.mxu1 %v1642_v32  ;;  %584 = vmatpush.bf16.msra.mxu3 %v1587_v13 }
  0x9e   :  { %v186_v51 = vpop.f32.mrf.mxu2 }
  0x9f   :  { %v204_v53 = vadd.f32 %v186_v51, %v141_v49 }
  0xa0   :  { %855 = vmatpush.bf16.msrb.mxu0 %v1593_v14 }
  0xa1   :  { %v216_v54 = vadd.f32 %v1637_v30, %v204_v53  ;;  %v96_v55 = vpop.f32.mrf.mxu0  ;;  %v143_v56 = vpop.f32.mrf.mxu1  ;;  %868 = vmatpush.bf16.msrb.mxu1 %v1674_v50  ;;  %585 = vmatpush.bf16.msra.mxu3 %v1593_v14 }
  0xa2   :  { %v144_v61 = vadd.f32 %v143_v56, %v96_v55 }
  0xa3   :  { %v224_v58 = vmax.f32 %v216_v54, 0.0 }
  0xa4   :  { %856 = vmatpush.bf16.msrb.mxu0 %v1608_v18 }
  0xa5   :  { %v230_v59 = vpack.c.bf16 %v224_v58, %v223_v57  ;;  %869 = vmatpush.bf16.msrb.mxu1 %v1691_v62  ;;  %586 = vmatpush.bf16.msra.mxu3 %v1608_v18  ;;  %v1749_v58 = vld [vmem:[%s1990_s5 + $0x1] ss:$0 sm:$0xff] }
  0xa6   :  { %v189_v60 = vpop.f32.mrf.mxu2 }
  0xa7   :  { %1242 = vmatmul.msk.bf16.gmra.mxu3 %vm245_vm2, %v230_v59  ;;  %1253 = vmatmul.msk.bf16.gmra.mxu0 %vm245_vm2, %v230_v59  ;;  %v205_v1 = vadd.f32 %v189_v60, %v144_v61  ;;  %v1757_v60 = vld [vmem:[%s1990_s5 + $0x2] ss:$0 sm:$0xff] }
  0xa8   :  { %1264 = vmatmul.msk.bf16.gmra.mxu1 %vm245_vm2, %v230_v59 }
  0xa9   :  { %v99_v63 = vpop.f32.mrf.mxu0  ;;  %v146_v0 = vpop.f32.mrf.mxu1  ;;  %v217_v4 = vadd.f32 %v1637_v30, %v205_v1 }
  0xaa   :  { %v147_v2 = vadd.f32 %v146_v0, %v99_v63 }
  0xab   :  { %v225_v9 = vmax.f32 %v217_v4, 0.0 }
  0xae   :  { %v192_v3 = vpop.f32.mrf.mxu2 }
  0xaf   :  { %v206_v5 = vadd.f32 %v192_v3, %v147_v2 }
  0xb1   :  { %v218_v6 = vadd.f32 %v1637_v30, %v206_v5  ;;  %v102_v7 = vpop.f32.mrf.mxu0  ;;  %v149_v8 = vpop.f32.mrf.mxu1 }
  0xb2   :  { %v150_v16 = vadd.f32 %v149_v8, %v102_v7 }
  0xb3   :  { %v226_v10 = vmax.f32 %v218_v6, 0.0  ;;  %v1771_v6 = vld [vmem:[%s1993_s6 + $0x2] ss:$0 sm:$0xff] }
  0xb5   :  { %v231_v11 = vpack.c.bf16 %v226_v10, %v225_v9 }
  0xb6   :  { %v195_v15 = vpop.f32.mrf.mxu2 }
  0xb7   :  { %1243 = vmatmul.msk.bf16.gmra.mxu3 %vm245_vm2, %v231_v11  ;;  %1254 = vmatmul.msk.bf16.gmra.mxu0 %vm245_vm2, %v231_v11  ;;  %v207_v22 = vadd.f32 %v195_v15, %v150_v16 }
  0xb8   :  { %1265 = vmatmul.msk.bf16.gmra.mxu1 %vm245_vm2, %v231_v11 }
  0xb9   :  { %v105_v17 = vpop.f32.mrf.mxu0  ;;  %v152_v21 = vpop.f32.mrf.mxu1  ;;  %v219_v26 = vadd.f32 %v1637_v30, %v207_v22 }
  0xba   :  { %v153_v24 = vadd.f32 %v152_v21, %v105_v17 }
  0xbb   :  { %v227_v31 = vmax.f32 %v219_v26, 0.0 }
  0xbe   :  { %v198_v25 = vpop.f32.mrf.mxu2 }
  0xbf   :  { %v208_v27 = vadd.f32 %v198_v25, %v153_v24 }
  0xc1   :  { %v220_v29 = vadd.f32 %v1637_v30, %v208_v27 }
  0xc3   :  { %v228_v34 = vmax.f32 %v220_v29, 0.0 }
  0xc5   :  { %v232_v35 = vpack.c.bf16 %v228_v34, %v227_v31 }
  0xc6   :  { %v444_v30 = vpop.f32.mrf.mxu2 }
  0xc7   :  { %1244 = vmatmul.msk.bf16.gmra.mxu3 %vm245_vm2, %v232_v35  ;;  %1255 = vmatmul.msk.bf16.gmra.mxu0 %vm245_vm2, %v232_v35  ;;  %v445_v41 = vadd.f32 %v1726_v39, %v444_v30 }
  0xc8   :  { %1266 = vmatmul.msk.bf16.gmra.mxu1 %vm245_vm2, %v232_v35 }
  0xce   :  { %v446_v36 = vpop.f32.mrf.mxu2 }
  0xd6   :  { %v524_v42 = vpop.f32.mrf.mxu2 }
  0xd7   :  { %483 = vmatmul.bf16.vlgmr.msrb.gmra.mxu3 %v1482_v19  ;;  %v1731_v19 = vld [vmem:[%s1990_s5] ss:$0 sm:$0xff]  ;;  %v525_v21 = vadd.f32 %v1771_v6, %v524_v42 }
  0xd8   :  { %609 = vmatpush.bf16.msrb.mxu3 %v1625_v23 }
  0xdc   :  { %610 = vmatpush.bf16.msrb.mxu3 %v1632_v28 }
  0xde   :  { %v526_v49 = vpop.f32.mrf.mxu2 }
  0xe0   :  { %611 = vmatpush.bf16.msrb.mxu3 %v1650_v33 }
  0xe4   :  { %612 = vmatpush.bf16.msrb.mxu3 %v1659_v40 }
 0x114   :  { %v1719_v37 = vpop.f32.mrf.mxu0 }
 0x115   :  { %v1721_v38 = vpop.f32.mrf.mxu1 }
 0x11a   :  { %v267_v43 = vpop.f32.mrf.mxu3 }
 0x11b   :  { %v268_v44 = vadd.f32 %v1731_v19, %v267_v43 }
 0x11c   :  { %v1735_v45 = vpop.f32.mrf.mxu0 }
 0x11d   :  { %v528_v46 = vadd.f32 %v445_v41, %v268_v44  ;;  %v1737_v47 = vpop.f32.mrf.mxu1 }
 0x11f   :  { %v1333_v48 = vmul.f32 -1.442695, %v528_v46 }
 0x121   :  { %1394 = vpow2.f32 %v1333_v48 }
 0x122   :  { %v269_v51 = vpop.f32.mrf.mxu3 }
 0x123   :  { %v1740_v52 = vadd.f32 %v1731_v19, %v269_v51 }
 0x124   :  { %v1742_v53 = vpop.f32.mrf.mxu0 }
 0x125   :  { %v1744_v54 = vpop.f32.mrf.mxu1 }
 0x127   :  { %v1395_v55 = vpop.eup %1394 }
 0x128   :  { %v532_v56 = vadd.f32 1.0, %v1395_v55 }
 0x12a   :  { %1396 = vrcp.f32 %v532_v56  ;;  %v272_v57 = vpop.f32.mrf.mxu3  ;;  %v544_v9 = vand.u32 2147483648, %v532_v56  ;;  %v542_v16 = vand.u32 2147483647, %v532_v56  ;;  %vm538_vm4 = vweird.f32 %v532_v56 }
 0x12b   :  { %v1752_v59 = vadd.f32 %v1731_v19, %v272_v57  ;;  %v1807_v57 = vld [vmem:[%s1993_s6 + $0x1] ss:$0 sm:$0xff] }
 0x12c   :  { %v317_v61 = vpop.f32.mrf.mxu0  ;;  %v545_v24 = vor.u32 1.1754944e-38, %v544_v9  ;;  %vm543_vm6 = vcmp.eq.f32.partialorder %v542_v16, 8.507059e+37 }
 0x12d   :  { %v1760_v63 = vadd.f32 %v1749_v58, %v317_v61  ;;  %v360_v0 = vpop.f32.mrf.mxu1 }
 0x12e   :  { %v1763_v1 = vadd.f32 %v1757_v60, %v360_v0  ;;  %v311_v0 = vadd.f32 %v1749_v58, %v1719_v37 }
 0x130   :  { %v1397_v2 = vpop.eup %1396 }
 0x131   :  { %v534_v3 = vmul.f32 %v1397_v2, %v532_v56  ;;  %vm539_vm3 = vweird.f32 %v1397_v2 }
 0x132   :  { %v274_v4 = vpop.f32.mrf.mxu3  ;;  %vm540_vm5 = vmor %vm538_vm4, %vm539_vm3 }
 0x133   :  { %v1766_v5 = vadd.f32 %v1731_v19, %v274_v4  ;;  %v535_v7 = vsub.f32 1.0, %v534_v3 }
 0x134   :  { %v320_v8 = vpop.f32.mrf.mxu0 }
 0x135   :  { %v1774_v10 = vadd.f32 %v1749_v58, %v320_v8  ;;  %v363_v11 = vpop.f32.mrf.mxu1  ;;  %v536_v15 = vmul.f32 %v1397_v2, %v535_v7 }
 0x136   :  { %v1777_v17 = vadd.f32 %v1757_v60, %v363_v11  ;;  %v354_v11 = vadd.f32 %v1757_v60, %v1721_v38 }
 0x137   :  { %v537_v22 = vadd.f32 %v1397_v2, %v536_v15 }
 0x139   :  { %v541_v25 = vsel %vm540_vm5, %v1397_v2, %v537_v22 }
 0x13a   :  { %v546_v26 = vsel %vm543_vm6, %v545_v24, %v541_v25  ;;  %v277_v27 = vpop.f32.mrf.mxu3 }
 0x13b   :  { %v568_v29 = vmul.f32 %v546_v26, %v525_v21  ;;  %v1781_v31 = vadd.f32 %v1731_v19, %v277_v27 }
 0x13c   :  { %v322_v34 = vpop.f32.mrf.mxu0 }
 0x13d   :  { %v1784_v35 = vadd.f32 %v1749_v58, %v322_v34  ;;  %v365_v30 = vpop.f32.mrf.mxu1  ;;  %v569_v16 = vadd.f32 %v568_v29, %v354_v11 }
 0x13e   :  { %v1787_v36 = vadd.f32 %v1757_v60, %v365_v30 }
 0x142   :  { %v279_v41 = vpop.f32.mrf.mxu3 }
 0x143   :  { %v1790_v42 = vadd.f32 %v1731_v19, %v279_v41 }
 0x144   :  { %v325_v43 = vpop.f32.mrf.mxu0 }
 0x145   :  { %v1793_v44 = vadd.f32 %v1749_v58, %v325_v43  ;;  %v368_v46 = vpop.f32.mrf.mxu1 }
 0x146   :  { %v1796_v48 = vadd.f32 %v1757_v60, %v368_v46 }
 0x14a   :  { %v282_v49 = vpop.f32.mrf.mxu3 }
 0x14b   :  { %v1799_v51 = vadd.f32 %v1731_v19, %v282_v49 }
 0x152   :  { %v284_v55 = vpop.f32.mrf.mxu3 }
 0x153   :  { %v1802_v56 = vadd.f32 %v1731_v19, %v284_v55 }
 0x15a   :  { %v484_v61 = vpop.f32.mrf.mxu3 }
 0x15b   :  { %v485_v2 = vadd.f32 %v1807_v57, %v484_v61  ;;  %v313_v61 = vadd.f32 %v1749_v58, %v1735_v45 }
 0x15d   :  { %v548_v3 = vadd.f32 %v485_v2, %v311_v0 }
 0x15f   :  { %v1334_v4 = vmul.f32 -1.442695, %v548_v3 }
 0x161   :  { %1398 = vpow2.f32 %v1334_v4 }
 0x162   :  { %v486_v7 = vpop.f32.mrf.mxu3 }
 0x167   :  { %v1399_v8 = vpop.eup %1398 }
 0x168   :  { %v552_v9 = vadd.f32 1.0, %v1399_v8 }
 0x16a   :  { %1400 = vrcp.f32 %v552_v9  ;;  %v564_v22 = vand.u32 2147483648, %v552_v9  ;;  %v562_v37 = vand.u32 2147483647, %v552_v9  ;;  %vm558_vm8 = vweird.f32 %v552_v9 }
 0x16b   :  { %1402 = vtanh.f32 %v569_v16 }
 0x16c   :  { %v565_v26 = vor.u32 1.1754944e-38, %v564_v22  ;;  %vm563_vm10 = vcmp.eq.f32.partialorder %v562_v37, 8.507059e+37 }
 0x170   :  { %v1401_v19 = vpop.eup %1400 }
 0x171   :  { %v554_v15 = vmul.f32 %v1401_v19, %v552_v9  ;;  %vm559_vm7 = vweird.f32 %v1401_v19  ;;  %v1403_v41 = vpop.eup %1402 }
 0x172   :  { %vm560_vm9 = vmor %vm558_vm8, %vm559_vm7 }
 0x173   :  { %v555_v21 = vsub.f32 1.0, %v554_v15 }
 0x175   :  { %v556_v24 = vmul.f32 %v1401_v19, %v555_v21 }
 0x177   :  { %v557_v25 = vadd.f32 %v1401_v19, %v556_v24 }
 0x179   :  { %v561_v27 = vsel %vm560_vm9, %v1401_v19, %v557_v25 }
 0x17a   :  { %v566_v34 = vsel %vm563_vm10, %v565_v26, %v561_v27 }
 0x17b   :  { %v571_v30 = vsub.f32 1.0, %v566_v34  ;;  %v573_v46 = vmul.f32 0.0, %v566_v34 }
 0x17d   :  { %v572_v43 = vmul.f32 %v1403_v41, %v571_v30 }
 0x17f   :  { %v1814_v38 = vadd.f32 %v573_v46, %v572_v43 }
 0x181   :  { %v575_v29 = vpack.c.bf16 %v1814_v38, %v1814_v38 }
 0x183   :  { %1335 = vmatmul.msk.bf16.vlgmr.msra.gmra.mxu3 %vm431_vm11, %v575_v29  ;;  %1336 = vmatmul.msk.bf16.vlgmr.msrb.gmra.mxu2 %vm431_vm11, %v575_v29 }
 0x184   :  { %686 = vmatpush.bf16.msra.mxu3 %v1617_v20  ;;  %776 = vmatpush.bf16.msrb.mxu2 %v1617_v20 }
 0x188   :  { %687 = vmatpush.bf16.msra.mxu3 %v1642_v32  ;;  %777 = vmatpush.bf16.msrb.mxu2 %v1642_v32 }
 0x18c   :  { %688 = vmatpush.bf16.msra.mxu3 %v1674_v50  ;;  %778 = vmatpush.bf16.msrb.mxu2 %v1674_v50 }
 0x190   :  { %689 = vmatpush.bf16.msra.mxu3 %v1691_v62  ;;  %779 = vmatpush.bf16.msrb.mxu2 %v1691_v62 }
 0x193   :  { %1337 = vmatmul.msk.bf16.vlgmr.msrb.gmra.mxu3 %vm431_vm11, %v575_v29 }
 0x194   :  { %789 = vmatpush.bf16.msrb.mxu3 %v1625_v23 }
 0x198   :  { %790 = vmatpush.bf16.msrb.mxu3 %v1632_v28 }
 0x19c   :  { %791 = vmatpush.bf16.msrb.mxu3 %v1650_v33 }
 0x1a0   :  { %792 = vmatpush.bf16.msrb.mxu3 %v1659_v40 }
 0x206   :  { %v588_v49 = vpop.f32.mrf.mxu3  ;;  %v601_v55 = vpop.f32.mrf.mxu2 }
 0x207   :  { %v589_v0 = vadd.f32 %v1726_v39, %v588_v49  ;;  %v602_v2 = vadd.f32 %v1807_v57, %v601_v55 }
 0x209   :  { %v618_v3 = vadd.f32 %v589_v0, %v1740_v52  ;;  %v638_v4 = vadd.f32 %v602_v2, %v313_v61  ;;  %v356_v2 = vadd.f32 %v1757_v60, %v1737_v47 }
 0x20b   :  { %v1338_v7 = vmul.f32 -1.442695, %v618_v3  ;;  %v1339_v8 = vmul.f32 -1.442695, %v638_v4 }
 0x20d   :  { %1404 = vpow2.f32 %v1338_v7 }
 0x20e   :  { %1406 = vpow2.f32 %v1339_v8  ;;  %v590_v9 = vpop.f32.mrf.mxu3  ;;  %v603_v19 = vpop.f32.mrf.mxu2 }
 0x213   :  { %v1405_v11 = vpop.eup %1404 }
 0x214   :  { %v1407_v15 = vpop.eup %1406  ;;  %v622_v16 = vadd.f32 1.0, %v1405_v11 }
 0x215   :  { %v642_v21 = vadd.f32 1.0, %v1407_v15 }
 0x216   :  { %1408 = vrcp.f32 %v622_v16  ;;  %v614_v22 = vpop.f32.mrf.mxu3  ;;  %v634_v34 = vand.u32 2147483648, %v622_v16  ;;  %v632_v41 = vand.u32 2147483647, %v622_v16  ;;  %vm628_vm13 = vweird.f32 %v622_v16 }
 0x217   :  { %1410 = vrcp.f32 %v642_v21  ;;  %v615_v49 = vadd.f32 %v1771_v6, %v614_v22  ;;  %v654_v3 = vand.u32 2147483648, %v642_v21  ;;  %vm648_vm1 = vweird.f32 %v642_v21 }
 0x218   :  { %v635_v29 = vor.u32 1.1754944e-38, %v634_v34  ;;  %vm633_vm15 = vcmp.eq.f32.partialorder %v632_v41, 8.507059e+37  ;;  %v652_v7 = vand.u32 2147483647, %v642_v21 }
 0x219   :  { %v655_v19 = vor.u32 1.1754944e-38, %v654_v3 }
 0x21a   :  { %vm653_vm3 = vcmp.eq.f32.partialorder %v652_v7, 8.507059e+37 }
 0x21c   :  { %v1409_v45 = vpop.eup %1408 }
 0x21d   :  { %v1411_v24 = vpop.eup %1410  ;;  %v624_v37 = vmul.f32 %v1409_v45, %v622_v16  ;;  %vm629_vm12 = vweird.f32 %v1409_v45 }
 0x21e   :  { %v644_v25 = vmul.f32 %v1411_v24, %v642_v21  ;;  %v616_v26 = vpop.f32.mrf.mxu3  ;;  %vm630_vm14 = vmor %vm628_vm13, %vm629_vm12  ;;  %vm649_vm0 = vweird.f32 %v1411_v24 }
 0x21f   :  { %v625_v52 = vsub.f32 1.0, %v624_v37  ;;  %vm650_vm2 = vmor %vm648_vm1, %vm649_vm0  ;;  %v316_v26 = vadd.f32 %v1749_v58, %v1742_v53 }
 0x220   :  { %v645_v27 = vsub.f32 1.0, %v644_v25 }
 0x221   :  { %v626_v30 = vmul.f32 %v1409_v45, %v625_v52 }
 0x222   :  { %v646_v43 = vmul.f32 %v1411_v24, %v645_v27 }
 0x223   :  { %v627_v46 = vadd.f32 %v1409_v45, %v626_v30 }
 0x224   :  { %v647_v0 = vadd.f32 %v1411_v24, %v646_v43 }
 0x225   :  { %v631_v55 = vsel %vm630_vm14, %v1409_v45, %v627_v46 }
 0x226   :  { %v636_v61 = vsel %vm633_vm15, %v635_v29, %v631_v55  ;;  %v651_v9 = vsel %vm650_vm2, %v1411_v24, %v647_v0 }
 0x227   :  { %v658_v4 = vmul.f32 %v636_v61, %v615_v49  ;;  %v656_v11 = vsel %vm653_vm3, %v655_v19, %v651_v9 }
 0x228   :  { %v661_v15 = vsub.f32 1.0, %v656_v11  ;;  %v663_v45 = vmul.f32 %v656_v11, %v1814_v38  ;;  %v1861_v38 = vpop.f32.mrf.mxu0 }
 0x229   :  { %v659_v8 = vadd.f32 %v658_v4, %v356_v2 }
 0x22b   :  { %1412 = vtanh.f32 %v659_v8 }
 0x231   :  { %v1413_v16 = vpop.eup %1412 }
 0x232   :  { %v662_v22 = vmul.f32 %v1413_v16, %v661_v15 }
 0x234   :  { %v1842_v37 = vadd.f32 %v663_v45, %v662_v22 }
 0x236   :  { %v665_v47 = vpack.c.bf16 %v1842_v37, %v1842_v37 }
 0x238   :  { %1340 = vmatmul.msk.bf16.vlgmr.msra.gmra.mxu2 %vm431_vm11, %v665_v47  ;;  %1341 = vmatmul.msk.bf16.vlgmr.msra.gmra.mxu3 %vm431_vm11, %v665_v47 }
 0x239   :  { %1342 = vmatmul.msk.bf16.vlgmr.msra.gmra.mxu0 %vm431_vm11, %v665_v47  ;;  %879 = vmatpush.bf16.msra.mxu2 %v1625_v23 }
 0x23a   :  { %943 = vmatpush.bf16.msra.mxu3 %v1581_v12  ;;  %956 = vmatpush.bf16.msra.mxu0 %v1617_v20 }
 0x23d   :  { %880 = vmatpush.bf16.msra.mxu2 %v1632_v28 }
 0x23e   :  { %944 = vmatpush.bf16.msra.mxu3 %v1587_v13  ;;  %957 = vmatpush.bf16.msra.mxu0 %v1642_v32 }
 0x241   :  { %881 = vmatpush.bf16.msra.mxu2 %v1650_v33 }
 0x242   :  { %945 = vmatpush.bf16.msra.mxu3 %v1593_v14  ;;  %958 = vmatpush.bf16.msra.mxu0 %v1674_v50 }
 0x245   :  { %882 = vmatpush.bf16.msra.mxu2 %v1659_v40 }
 0x246   :  { %946 = vmatpush.bf16.msra.mxu3 %v1608_v18  ;;  %959 = vmatpush.bf16.msra.mxu0 %v1691_v62 }
 0x2b6   :  { %v704_v21 = vpop.f32.mrf.mxu0 }
 0x2b7   :  { %v705_v22 = vadd.f32 %v1771_v6, %v704_v21 }
 0x2bb   :  { %v678_v24 = vpop.f32.mrf.mxu2  ;;  %v691_v25 = vpop.f32.mrf.mxu3 }
 0x2bc   :  { %v679_v52 = vadd.f32 %v1726_v39, %v678_v24  ;;  %v692_v27 = vadd.f32 %v1807_v57, %v691_v25  ;;  %v359_v25 = vadd.f32 %v1757_v60, %v1744_v54  ;;  %v1891_v60 = vpop.f32.mrf.mxu1 }
 0x2be   :  { %v708_v34 = vadd.f32 %v679_v52, %v1752_v59  ;;  %v728_v30 = vadd.f32 %v692_v27, %v316_v26  ;;  %v706_v41 = vpop.f32.mrf.mxu0 }
 0x2c0   :  { %v1343_v43 = vmul.f32 -1.442695, %v708_v34  ;;  %v1344_v46 = vmul.f32 -1.442695, %v728_v30 }
 0x2c2   :  { %1414 = vpow2.f32 %v1343_v43 }
 0x2c3   :  { %1416 = vpow2.f32 %v1344_v46  ;;  %v680_v29 = vpop.f32.mrf.mxu2  ;;  %v693_v49 = vpop.f32.mrf.mxu3 }
 0x2c8   :  { %v1415_v55 = vpop.eup %1414 }
 0x2c9   :  { %v1417_v61 = vpop.eup %1416  ;;  %v712_v0 = vadd.f32 1.0, %v1415_v55 }
 0x2ca   :  { %v732_v2 = vadd.f32 1.0, %v1417_v61 }
 0x2cb   :  { %1418 = vrcp.f32 %v712_v0  ;;  %v724_v59 = vand.u32 2147483648, %v712_v0  ;;  %v722_v19 = vand.u32 2147483647, %v712_v0  ;;  %vm718_vm5 = vweird.f32 %v712_v0 }
 0x2cc   :  { %1420 = vrcp.f32 %v732_v2  ;;  %v744_v52 = vand.u32 2147483648, %v732_v2  ;;  %vm738_vm9 = vweird.f32 %v732_v2  ;;  %v742_v27 = vand.u32 2147483647, %v732_v2 }
 0x2cd   :  { %v725_v16 = vor.u32 1.1754944e-38, %v724_v59  ;;  %vm723_vm7 = vcmp.eq.f32.partialorder %v722_v19, 8.507059e+37 }
 0x2ce   :  { %v745_v41 = vor.u32 1.1754944e-38, %v744_v52  ;;  %vm743_vm12 = vcmp.eq.f32.partialorder %v742_v27, 8.507059e+37 }
 0x2d1   :  { %v1419_v53 = vpop.eup %1418 }
 0x2d2   :  { %v1421_v58 = vpop.eup %1420  ;;  %v714_v3 = vmul.f32 %v1419_v53, %v712_v0  ;;  %vm719_vm4 = vweird.f32 %v1419_v53 }
 0x2d3   :  { %v734_v4 = vmul.f32 %v1421_v58, %v732_v2  ;;  %vm720_vm6 = vmor %vm718_vm5, %vm719_vm4  ;;  %vm739_vm8 = vweird.f32 %v1421_v58 }
 0x2d4   :  { %v715_v7 = vsub.f32 1.0, %v714_v3  ;;  %vm740_vm10 = vmor %vm738_vm9, %vm739_vm8 }
 0x2d5   :  { %v735_v8 = vsub.f32 1.0, %v734_v4 }
 0x2d6   :  { %v716_v9 = vmul.f32 %v1419_v53, %v715_v7 }
 0x2d7   :  { %v736_v11 = vmul.f32 %v1421_v58, %v735_v8 }
 0x2d8   :  { %v717_v15 = vadd.f32 %v1419_v53, %v716_v9 }
 0x2d9   :  { %v737_v24 = vadd.f32 %v1421_v58, %v736_v11 }
 0x2da   :  { %v721_v45 = vsel %vm720_vm6, %v1419_v53, %v717_v15 }
 0x2db   :  { %v726_v47 = vsel %vm723_vm7, %v725_v16, %v721_v45  ;;  %v741_v30 = vsel %vm740_vm10, %v1421_v58, %v737_v24 }
 0x2dc   :  { %v748_v26 = vmul.f32 %v726_v47, %v705_v22  ;;  %v746_v43 = vsel %vm743_vm12, %v745_v41, %v741_v30 }
 0x2dd   :  { %v751_v21 = vsub.f32 1.0, %v746_v43  ;;  %v753_v49 = vmul.f32 %v746_v43, %v1842_v37 }
 0x2de   :  { %v749_v34 = vadd.f32 %v748_v26, %v359_v25 }
 0x2e0   :  { %1422 = vtanh.f32 %v749_v34 }
 0x2e6   :  { %v1423_v46 = vpop.eup %1422 }
 0x2e7   :  { %v752_v29 = vmul.f32 %v1423_v46, %v751_v21 }
 0x2e9   :  { %v1872_v55 = vadd.f32 %v753_v49, %v752_v29 }
 0x2eb   :  { %v755_v54 = vpack.c.bf16 %v1872_v55, %v1872_v55 }
 0x2ed   :  { %1345 = vmatmul.msk.bf16.vlgmr.msra.gmra.mxu1 %vm431_vm11, %v755_v54  ;;  %1346 = vmatmul.msk.bf16.vlgmr.msrb.gmra.mxu2 %vm431_vm11, %v755_v54 }
 0x2ee   :  { %1347 = vmatmul.msk.bf16.vlgmr.msrb.gmra.mxu3 %vm431_vm11, %v755_v54  ;;  %969 = vmatpush.bf16.msra.mxu1 %v1625_v23 }
 0x2ef   :  { %1033 = vmatpush.bf16.msrb.mxu2 %v1581_v12  ;;  %1046 = vmatpush.bf16.msrb.mxu3 %v1617_v20 }
 0x2f2   :  { %970 = vmatpush.bf16.msra.mxu1 %v1632_v28 }
 0x2f3   :  { %1034 = vmatpush.bf16.msrb.mxu2 %v1587_v13  ;;  %1047 = vmatpush.bf16.msrb.mxu3 %v1642_v32 }
 0x2f6   :  { %971 = vmatpush.bf16.msra.mxu1 %v1650_v33 }
 0x2f7   :  { %1035 = vmatpush.bf16.msrb.mxu2 %v1593_v14  ;;  %1048 = vmatpush.bf16.msrb.mxu3 %v1674_v50 }
 0x2fa   :  { %972 = vmatpush.bf16.msra.mxu1 %v1659_v40 }
 0x2fb   :  { %1036 = vmatpush.bf16.msrb.mxu2 %v1608_v18  ;;  %1049 = vmatpush.bf16.msrb.mxu3 %v1691_v62 }
 0x36a   :  { %v768_v37 = vpop.f32.mrf.mxu1 }
 0x36b   :  { %v769_v61 = vadd.f32 %v1726_v39, %v768_v37 }
 0x36d   :  { %v798_v0 = vadd.f32 %v769_v61, %v1766_v5 }
 0x36f   :  { %v1348_v2 = vmul.f32 -1.442695, %v798_v0 }
 0x370   :  { %v781_v53 = vpop.f32.mrf.mxu2 }
 0x371   :  { %1424 = vpow2.f32 %v1348_v2  ;;  %v782_v58 = vadd.f32 %v1807_v57, %v781_v53  ;;  %v794_v3 = vpop.f32.mrf.mxu3 }
 0x372   :  { %v770_v4 = vpop.f32.mrf.mxu1  ;;  %v795_v30 = vadd.f32 %v1771_v6, %v794_v3 }
 0x373   :  { %v818_v7 = vadd.f32 %v782_v58, %v1760_v63 }
 0x375   :  { %v1349_v59 = vmul.f32 -1.442695, %v818_v7 }
 0x377   :  { %v1425_v8 = vpop.eup %1424  ;;  %1426 = vpow2.f32 %v1349_v59 }
 0x378   :  { %v802_v9 = vadd.f32 1.0, %v1425_v8  ;;  %v783_v19 = vpop.f32.mrf.mxu2 }
 0x379   :  { %v796_v11 = vpop.f32.mrf.mxu3 }
 0x37a   :  { %1428 = vrcp.f32 %v802_v9  ;;  %v814_v47 = vand.u32 2147483648, %v802_v9  ;;  %v812_v25 = vand.u32 2147483647, %v802_v9  ;;  %vm808_vm14 = vweird.f32 %v802_v9 }
 0x37c   :  { %v815_v27 = vor.u32 1.1754944e-38, %v814_v47  ;;  %vm813_vm0 = vcmp.eq.f32.partialorder %v812_v25, 8.507059e+37 }
 0x37d   :  { %v1427_v15 = vpop.eup %1426 }
 0x37e   :  { %v822_v16 = vadd.f32 1.0, %v1427_v15 }
 0x380   :  { %v1429_v22 = vpop.eup %1428  ;;  %1430 = vrcp.f32 %v822_v16  ;;  %v834_v46 = vand.u32 2147483648, %v822_v16  ;;  %v832_v49 = vand.u32 2147483647, %v822_v16  ;;  %vm828_vm2 = vweird.f32 %v822_v16 }
 0x381   :  { %v804_v5 = vmul.f32 %v1429_v22, %v802_v9  ;;  %vm809_vm13 = vweird.f32 %v1429_v22 }
 0x382   :  { %vm810_vm15 = vmor %vm808_vm14, %vm809_vm13  ;;  %v835_v61 = vor.u32 1.1754944e-38, %v834_v46  ;;  %vm833_vm4 = vcmp.eq.f32.partialorder %v832_v49, 8.507059e+37 }
 0x383   :  { %v805_v45 = vsub.f32 1.0, %v804_v5 }
 0x385   :  { %v806_v24 = vmul.f32 %v1429_v22, %v805_v45 }
 0x386   :  { %v1431_v26 = vpop.eup %1430 }
 0x387   :  { %v824_v52 = vmul.f32 %v1431_v26, %v822_v16  ;;  %v807_v63 = vadd.f32 %v1429_v22, %v806_v24  ;;  %vm829_vm1 = vweird.f32 %v1431_v26 }
 0x388   :  { %vm830_vm3 = vmor %vm828_vm2, %vm829_vm1 }
 0x389   :  { %v825_v34 = vsub.f32 1.0, %v824_v52  ;;  %v811_v41 = vsel %vm810_vm15, %v1429_v22, %v807_v63 }
 0x38a   :  { %v816_v43 = vsel %vm813_vm0, %v815_v27, %v811_v41 }
 0x38b   :  { %v826_v21 = vmul.f32 %v1431_v26, %v825_v34  ;;  %v838_v29 = vmul.f32 %v816_v43, %v795_v30 }
 0x38d   :  { %v827_v54 = vadd.f32 %v1431_v26, %v826_v21  ;;  %v839_v37 = vadd.f32 %v838_v29, %v1763_v1 }
 0x38f   :  { %v831_v0 = vsel %vm830_vm3, %v1431_v26, %v827_v54  ;;  %1432 = vtanh.f32 %v839_v37 }
 0x390   :  { %v836_v2 = vsel %vm833_vm4, %v835_v61, %v831_v0 }
 0x391   :  { %v841_v53 = vsub.f32 1.0, %v836_v2  ;;  %v843_v4 = vmul.f32 %v836_v2, %v1872_v55 }
 0x395   :  { %v1433_v58 = vpop.eup %1432 }
 0x396   :  { %v842_v3 = vmul.f32 %v1433_v58, %v841_v53  ;;  %v1475_v58 = vld [vmem:[%s1991_s4 + $0x50] sm:$0xff] }
 0x398   :  { %v1900_v7 = vadd.f32 %v843_v4, %v842_v3  ;;  %v1476_v3 = vld [vmem:[%s1991_s4 + $0x48] sm:$0xff] }
 0x39a   :  { %v845_v59 = vpack.c.bf16 %v1900_v7, %v1900_v7 }
 0x39c   :  { %1350 = vmatmul.msk.bf16.vlgmr.msrb.gmra.mxu0 %vm431_vm11, %v845_v59  ;;  %1351 = vmatmul.msk.bf16.vlgmr.msrb.gmra.mxu1 %vm431_vm11, %v845_v59 }
 0x39d   :  { %1352 = vmatmul.msk.bf16.vlgmr.msra.gmra.mxu2 %vm431_vm11, %v845_v59  ;;  %1059 = vmatpush.bf16.msrb.mxu0 %v1625_v23 }
 0x39e   :  { %1123 = vmatpush.bf16.msrb.mxu1 %v1581_v12  ;;  %1136 = vmatpush.bf16.msra.mxu2 %v1617_v20 }
 0x3a1   :  { %1060 = vmatpush.bf16.msrb.mxu0 %v1632_v28 }
 0x3a2   :  { %1124 = vmatpush.bf16.msrb.mxu1 %v1587_v13  ;;  %1137 = vmatpush.bf16.msra.mxu2 %v1642_v32 }
 0x3a5   :  { %1061 = vmatpush.bf16.msrb.mxu0 %v1650_v33 }
 0x3a6   :  { %1125 = vmatpush.bf16.msrb.mxu1 %v1593_v14  ;;  %1138 = vmatpush.bf16.msra.mxu2 %v1674_v50 }
 0x3a9   :  { %1062 = vmatpush.bf16.msrb.mxu0 %v1659_v40 }
 0x3aa   :  { %1126 = vmatpush.bf16.msrb.mxu1 %v1608_v18  ;;  %1139 = vmatpush.bf16.msra.mxu2 %v1691_v62 }
 0x419   :  { %v858_v12 = vpop.f32.mrf.mxu0  ;;  %v871_v20 = vpop.f32.mrf.mxu1 }
 0x41a   :  { %v859_v23 = vadd.f32 %v1726_v39, %v858_v12  ;;  %v872_v13 = vadd.f32 %v1807_v57, %v871_v20 }
 0x41c   :  { %v888_v28 = vadd.f32 %v859_v23, %v1781_v31  ;;  %v908_v32 = vadd.f32 %v872_v13, %v1774_v10 }
 0x41e   :  { %v1353_v33 = vmul.f32 -1.442695, %v888_v28  ;;  %v1354_v14 = vmul.f32 -1.442695, %v908_v32 }
 0x420   :  { %1434 = vpow2.f32 %v1353_v33  ;;  %v884_v50 = vpop.f32.mrf.mxu2 }
 0x421   :  { %1436 = vpow2.f32 %v1354_v14  ;;  %v860_v1 = vpop.f32.mrf.mxu0  ;;  %v873_v55 = vpop.f32.mrf.mxu1  ;;  %v885_v52 = vadd.f32 %v1771_v6, %v884_v50 }
 0x426   :  { %v1435_v18 = vpop.eup %1434 }
 0x427   :  { %v1437_v8 = vpop.eup %1436  ;;  %v892_v62 = vadd.f32 1.0, %v1435_v18 }
 0x428   :  { %v912_v9 = vadd.f32 1.0, %v1437_v8  ;;  %v886_v19 = vpop.f32.mrf.mxu2 }
 0x429   :  { %1438 = vrcp.f32 %v892_v62  ;;  %v904_v5 = vand.u32 2147483648, %v892_v62  ;;  %v902_v47 = vand.u32 2147483647, %v892_v62  ;;  %vm898_vm6 = vweird.f32 %v892_v62 }
 0x42a   :  { %1440 = vrcp.f32 %v912_v9  ;;  %v924_v30 = vand.u32 2147483648, %v912_v9  ;;  %vm918_vm10 = vweird.f32 %v912_v9  ;;  %v922_v43 = vand.u32 2147483647, %v912_v9 }
 0x42b   :  { %v905_v26 = vor.u32 1.1754944e-38, %v904_v5  ;;  %vm903_vm8 = vcmp.eq.f32.partialorder %v902_v47, 8.507059e+37 }
 0x42c   :  { %v925_v29 = vor.u32 1.1754944e-38, %v924_v30  ;;  %vm923_vm13 = vcmp.eq.f32.partialorder %v922_v43, 8.507059e+37 }
 0x42f   :  { %v1439_v11 = vpop.eup %1438 }
 0x430   :  { %v1441_v15 = vpop.eup %1440  ;;  %v894_v16 = vmul.f32 %v1439_v11, %v892_v62  ;;  %vm899_vm5 = vweird.f32 %v1439_v11 }
 0x431   :  { %v914_v31 = vmul.f32 %v1441_v15, %v912_v9  ;;  %vm900_vm7 = vmor %vm898_vm6, %vm899_vm5  ;;  %vm919_vm9 = vweird.f32 %v1441_v15 }
 0x432   :  { %v895_v22 = vsub.f32 1.0, %v894_v16  ;;  %vm920_vm12 = vmor %vm918_vm10, %vm919_vm9 }
 0x433   :  { %v915_v10 = vsub.f32 1.0, %v914_v31 }
 0x434   :  { %v896_v45 = vmul.f32 %v1439_v11, %v895_v22 }
 0x435   :  { %v916_v24 = vmul.f32 %v1441_v15, %v915_v10 }
 0x436   :  { %v897_v25 = vadd.f32 %v1439_v11, %v896_v45 }
 0x437   :  { %v917_v34 = vadd.f32 %v1441_v15, %v916_v24 }
 0x438   :  { %v901_v63 = vsel %vm900_vm7, %v1439_v11, %v897_v25 }
 0x439   :  { %v906_v27 = vsel %vm903_vm8, %v905_v26, %v901_v63  ;;  %v921_v46 = vsel %vm920_vm12, %v1441_v15, %v917_v34 }
 0x43a   :  { %v928_v41 = vmul.f32 %v906_v27, %v885_v52  ;;  %v926_v49 = vsel %vm923_vm13, %v925_v29, %v921_v46 }
 0x43b   :  { %v931_v54 = vsub.f32 1.0, %v926_v49  ;;  %v933_v0 = vmul.f32 %v926_v49, %v1900_v7 }
 0x43c   :  { %v929_v21 = vadd.f32 %v928_v41, %v1777_v17  ;;  %v1474_v17 = vld [vmem:[%s1991_s4 + $0x58] sm:$0xff] }
 0x43e   :  { %1442 = vtanh.f32 %v929_v21 }
 0x444   :  { %v1443_v37 = vpop.eup %1442 }
 0x445   :  { %v932_v61 = vmul.f32 %v1443_v37, %v931_v54 }
 0x447   :  { %v1926_v2 = vadd.f32 %v933_v0, %v932_v61 }
 0x449   :  { %v935_v53 = vpack.c.bf16 %v1926_v2, %v1926_v2 }
 0x44b   :  { %1355 = vmatmul.msk.bf16.vlgmr.msra.gmra.mxu3 %vm431_vm11, %v935_v53  ;;  %1356 = vmatmul.msk.bf16.vlgmr.msra.gmra.mxu0 %vm431_vm11, %v935_v53 }
 0x44c   :  { %1357 = vmatmul.msk.bf16.vlgmr.msra.gmra.mxu1 %vm431_vm11, %v935_v53  ;;  %1149 = vmatpush.bf16.msra.mxu3 %v1474_v17 }
 0x450   :  { %1150 = vmatpush.bf16.msra.mxu3 %v1475_v58 }
 0x454   :  { %1151 = vmatpush.bf16.msra.mxu3 %v1476_v3 }
 0x458   :  { %1152 = vmatpush.bf16.msra.mxu3 %v1659_v40 }
 0x4c8   :  { %v961_v4 = vpop.f32.mrf.mxu0 }
 0x4c9   :  { %v962_v7 = vadd.f32 %v1807_v57, %v961_v4  ;;  %v974_v59 = vpop.f32.mrf.mxu1 }
 0x4ca   :  { %v975_v5 = vadd.f32 %v1771_v6, %v974_v59 }
 0x4cb   :  { %v998_v12 = vadd.f32 %v962_v7, %v1784_v35 }
 0x4cd   :  { %v1359_v20 = vmul.f32 -1.442695, %v998_v12 }
 0x4ce   :  { %v948_v23 = vpop.f32.mrf.mxu3 }
 0x4cf   :  { %1444 = vpow2.f32 %v1359_v20  ;;  %v949_v13 = vadd.f32 %v1726_v39, %v948_v23 }
 0x4d0   :  { %v963_v28 = vpop.f32.mrf.mxu0 }
 0x4d1   :  { %v978_v32 = vadd.f32 %v949_v13, %v1790_v42  ;;  %v976_v33 = vpop.f32.mrf.mxu1 }
 0x4d3   :  { %v1358_v14 = vmul.f32 -1.442695, %v978_v32 }
 0x4d5   :  { %v1445_v50 = vpop.eup %1444  ;;  %1446 = vpow2.f32 %v1358_v14 }
 0x4d6   :  { %v1002_v1 = vadd.f32 1.0, %v1445_v50  ;;  %v950_v40 = vpop.f32.mrf.mxu3 }
 0x4d8   :  { %1448 = vrcp.f32 %v1002_v1  ;;  %v1014_v25 = vand.u32 2147483648, %v1002_v1  ;;  %vm1008_vm3 = vweird.f32 %v1002_v1  ;;  %v1012_v52 = vand.u32 2147483647, %v1002_v1 }
 0x4da   :  { %v1015_v34 = vor.u32 1.1754944e-38, %v1014_v25  ;;  %vm1013_vm5 = vcmp.eq.f32.partialorder %v1012_v52, 8.507059e+37 }
 0x4db   :  { %v1447_v55 = vpop.eup %1446 }
 0x4dc   :  { %v982_v18 = vadd.f32 1.0, %v1447_v55 }
 0x4de   :  { %1450 = vrcp.f32 %v982_v18  ;;  %v1449_v8 = vpop.eup %1448  ;;  %v994_v15 = vand.u32 2147483648, %v982_v18  ;;  %v992_v42 = vand.u32 2147483647, %v982_v18  ;;  %vm988_vm15 = vweird.f32 %v982_v18 }
 0x4df   :  { %v1004_v35 = vmul.f32 %v1449_v8, %v1002_v1  ;;  %vm1009_vm2 = vweird.f32 %v1449_v8 }
 0x4e0   :  { %v995_v10 = vor.u32 1.1754944e-38, %v994_v15  ;;  %vm993_vm1 = vcmp.eq.f32.partialorder %v992_v42, 8.507059e+37  ;;  %vm1010_vm4 = vmor %vm1008_vm3, %vm1009_vm2 }
 0x4e1   :  { %v1005_v19 = vsub.f32 1.0, %v1004_v35 }
 0x4e3   :  { %v1006_v31 = vmul.f32 %v1449_v8, %v1005_v19 }
 0x4e4   :  { %v1451_v62 = vpop.eup %1450 }
 0x4e5   :  { %v984_v9 = vmul.f32 %v1451_v62, %v982_v18  ;;  %vm989_vm14 = vweird.f32 %v1451_v62  ;;  %v1007_v47 = vadd.f32 %v1449_v8, %v1006_v31 }
 0x4e6   :  { %vm990_vm0 = vmor %vm988_vm15, %vm989_vm14 }
 0x4e7   :  { %v985_v11 = vsub.f32 1.0, %v984_v9  ;;  %v1011_v27 = vsel %vm1010_vm4, %v1449_v8, %v1007_v47 }
 0x4e8   :  { %v1016_v30 = vsel %vm1013_vm5, %v1015_v34, %v1011_v27  ;;  %v1478_v27 = vld [vmem:[%s1990_s5 + $0x1] ss:$0 sm:$0xff] }
 0x4e9   :  { %v986_v16 = vmul.f32 %v1451_v62, %v985_v11  ;;  %v1021_v41 = vsub.f32 1.0, %v1016_v30  ;;  %v1023_v46 = vmul.f32 %v1016_v30, %v1926_v2  ;;  %v328_v34 = vadd.f32 %v1478_v27, %v1861_v38 }
 0x4eb   :  { %v987_v22 = vadd.f32 %v1451_v62, %v986_v16 }
 0x4ed   :  { %v991_v45 = vsel %vm990_vm0, %v1451_v62, %v987_v22 }
 0x4ee   :  { %v996_v24 = vsel %vm993_vm1, %v995_v10, %v991_v45 }
 0x4ef   :  { %v1018_v26 = vmul.f32 %v996_v24, %v975_v5  ;;  %v1477_v24 = vld [vmem:[%s1993_s6] ss:$0 sm:$0xff] }
 0x4f1   :  { %v1019_v63 = vadd.f32 %v1018_v26, %v1787_v36 }
 0x4f3   :  { %1452 = vtanh.f32 %v1019_v63 }
 0x4f9   :  { %v1453_v43 = vpop.eup %1452 }
 0x4fa   :  { %v1022_v21 = vmul.f32 %v1453_v43, %v1021_v41 }
 0x4fc   :  { %v1024_v29 = vadd.f32 %v1023_v46, %v1022_v21 }
 0x4fe   :  { %v1025_v49 = vpack.c.bf16 %v1024_v29, %v1024_v29 }
 0x500   :  { %1360 = vmatmul.msk.bf16.vlgmr.msrb.gmra.mxu2 %vm431_vm11, %v1025_v49  ;;  %1361 = vmatmul.msk.bf16.vlgmr.msrb.gmra.mxu3 %vm431_vm11, %v1025_v49 }
 0x501   :  { %1362 = vmatmul.msk.bf16.vlgmr.msrb.gmra.mxu0 %vm431_vm11, %v1025_v49 }
 0x57e   :  { %v1064_v54 = vpop.f32.mrf.mxu0 }
 0x57f   :  { %v1065_v18 = vadd.f32 %v1771_v6, %v1064_v54 }
 0x583   :  { %v1038_v36 = vpop.f32.mrf.mxu2  ;;  %v1051_v37 = vpop.f32.mrf.mxu3 }
 0x584   :  { %v1039_v61 = vadd.f32 %v1726_v39, %v1038_v36  ;;  %v1052_v0 = vadd.f32 %v1807_v57, %v1051_v37 }
 0x586   :  { %v1068_v53 = vadd.f32 %v1039_v61, %v1799_v51  ;;  %v1088_v17 = vadd.f32 %v1052_v0, %v1793_v44  ;;  %v1066_v2 = vpop.f32.mrf.mxu0 }
 0x588   :  { %v1363_v58 = vmul.f32 -1.442695, %v1068_v53  ;;  %v1364_v3 = vmul.f32 -1.442695, %v1088_v17 }
 0x58a   :  { %1454 = vpow2.f32 %v1363_v58 }
 0x58b   :  { %1456 = vpow2.f32 %v1364_v3  ;;  %v1040_v4 = vpop.f32.mrf.mxu2  ;;  %v1053_v7 = vpop.f32.mrf.mxu3 }
 0x590   :  { %v1455_v59 = vpop.eup %1454 }
 0x591   :  { %v1457_v12 = vpop.eup %1456  ;;  %v1072_v20 = vadd.f32 1.0, %v1455_v59  ;;  %v1479_v59 = vld [vmem:[%s1993_s6 + $0x2] ss:$0 sm:$0xff] }
 0x592   :  { %v1092_v23 = vadd.f32 1.0, %v1457_v12 }
 0x593   :  { %1458 = vrcp.f32 %v1072_v20  ;;  %v1084_v33 = vand.u32 2147483648, %v1072_v20  ;;  %v1082_v50 = vand.u32 2147483647, %v1072_v20  ;;  %vm1078_vm7 = vweird.f32 %v1072_v20 }
 0x594   :  { %1460 = vrcp.f32 %v1092_v23  ;;  %v1104_v19 = vand.u32 2147483648, %v1092_v23  ;;  %vm1098_vm12 = vweird.f32 %v1092_v23  ;;  %v1102_v11 = vand.u32 2147483647, %v1092_v23 }
 0x595   :  { %v1085_v55 = vor.u32 1.1754944e-38, %v1084_v33  ;;  %vm1083_vm9 = vcmp.eq.f32.partialorder %v1082_v50, 8.507059e+37 }
 0x596   :  { %v1105_v42 = vor.u32 1.1754944e-38, %v1104_v19  ;;  %vm1103_vm14 = vcmp.eq.f32.partialorder %v1102_v11, 8.507059e+37 }
 0x599   :  { %v1459_v39 = vpop.eup %1458 }
 0x59a   :  { %v1461_v13 = vpop.eup %1460  ;;  %v1074_v28 = vmul.f32 %v1459_v39, %v1072_v20  ;;  %vm1079_vm6 = vweird.f32 %v1459_v39 }
 0x59b   :  { %v1094_v32 = vmul.f32 %v1461_v13, %v1092_v23  ;;  %vm1080_vm8 = vmor %vm1078_vm7, %vm1079_vm6  ;;  %vm1099_vm10 = vweird.f32 %v1461_v13  ;;  %v1480_v23 = vld [vmem:[%s1990_s5 + $0x2] ss:$0 sm:$0xff] }
 0x59c   :  { %v1075_v51 = vsub.f32 1.0, %v1074_v28  ;;  %vm1100_vm13 = vmor %vm1098_vm12, %vm1099_vm10 }
 0x59d   :  { %v1095_v44 = vsub.f32 1.0, %v1094_v32 }
 0x59e   :  { %v1076_v14 = vmul.f32 %v1459_v39, %v1075_v51 }
 0x59f   :  { %v1096_v1 = vmul.f32 %v1461_v13, %v1095_v44 }
 0x5a0   :  { %v1077_v40 = vadd.f32 %v1459_v39, %v1076_v14 }
 0x5a1   :  { %v1097_v62 = vadd.f32 %v1461_v13, %v1096_v1 }
 0x5a2   :  { %v1081_v8 = vsel %vm1080_vm8, %v1459_v39, %v1077_v40  ;;  %v371_v39 = vadd.f32 %v1480_v23, %v1891_v60 }
 0x5a3   :  { %v1086_v35 = vsel %vm1083_vm9, %v1085_v55, %v1081_v8  ;;  %v1101_v16 = vsel %vm1100_vm13, %v1461_v13, %v1097_v62 }
 0x5a4   :  { %v1108_v9 = vmul.f32 %v1086_v35, %v1065_v18  ;;  %v1106_v31 = vsel %vm1103_vm14, %v1105_v42, %v1101_v16 }
 0x5a5   :  { %v1111_v22 = vsub.f32 1.0, %v1106_v31  ;;  %v1113_v5 = vmul.f32 %v1106_v31, %v1024_v29 }
 0x5a6   :  { %v1109_v15 = vadd.f32 %v1108_v9, %v1796_v48 }
 0x5a8   :  { %1462 = vtanh.f32 %v1109_v15 }
 0x5ae   :  { %v1463_v10 = vpop.eup %1462 }
 0x5af   :  { %v1112_v6 = vmul.f32 %v1463_v10, %v1111_v22 }
 0x5b1   :  { %v1959_v45 = vadd.f32 %v1113_v5, %v1112_v6 }
 0x5b3   :  { %v1115_v47 = vpack.c.bf16 %v1959_v45, %v1959_v45 }
 0x5b5   :  { %1365 = vmatmul.msk.bf16.vlgmr.msrb.gmra.mxu1 %vm431_vm11, %v1115_v47  ;;  %1366 = vmatmul.msk.bf16.vlgmr.msra.gmra.mxu2 %vm431_vm11, %v1115_v47 }
 0x5b6   :  { %1367 = vmatmul.msk.bf16.vlgmr.msra.gmra.mxu3 %vm431_vm11, %v1115_v47 }
 0x632   :  { %v1128_v48 = vpop.f32.mrf.mxu1 }
 0x633   :  { %v1129_v25 = vadd.f32 %v1477_v24, %v1128_v48 }
 0x635   :  { %v1158_v26 = vadd.f32 %v1129_v25, %v1802_v56 }
 0x637   :  { %v1368_v52 = vmul.f32 -1.442695, %v1158_v26 }
 0x638   :  { %v1141_v63 = vpop.f32.mrf.mxu2 }
 0x639   :  { %1464 = vpow2.f32 %v1368_v52  ;;  %v1142_v30 = vadd.f32 %v1807_v57, %v1141_v63  ;;  %v1154_v41 = vpop.f32.mrf.mxu3 }
 0x63a   :  { %v1130_v43 = vpop.f32.mrf.mxu1  ;;  %v1155_v12 = vadd.f32 %v1479_v59, %v1154_v41 }
 0x63b   :  { %v1178_v21 = vadd.f32 %v1142_v30, %v328_v34 }
 0x63d   :  { %v1369_v46 = vmul.f32 -1.442695, %v1178_v21 }
 0x63f   :  { %v1465_v29 = vpop.eup %1464  ;;  %1466 = vpow2.f32 %v1369_v46 }
 0x640   :  { %v1162_v49 = vadd.f32 1.0, %v1465_v29  ;;  %v1143_v54 = vpop.f32.mrf.mxu2 }
 0x641   :  { %v1156_v56 = vpop.f32.mrf.mxu3 }
 0x642   :  { %1468 = vrcp.f32 %v1162_v49  ;;  %v1174_v38 = vand.u32 2147483648, %v1162_v49  ;;  %v1172_v57 = vand.u32 2147483647, %v1162_v49  ;;  %vm1168_vm0 = vweird.f32 %v1162_v49 }
 0x644   :  { %v1175_v4 = vor.u32 1.1754944e-38, %v1174_v38  ;;  %vm1173_vm2 = vcmp.eq.f32.partialorder %v1172_v57, 8.507059e+37 }
 0x645   :  { %v1467_v36 = vpop.eup %1466 }
 0x646   :  { %v1182_v37 = vadd.f32 1.0, %v1467_v36 }
 0x648   :  { %v1469_v61 = vpop.eup %1468  ;;  %1470 = vrcp.f32 %v1182_v37  ;;  %v1194_v32 = vand.u32 2147483648, %v1182_v37  ;;  %v1192_v33 = vand.u32 2147483647, %v1182_v37  ;;  %vm1188_vm4 = vweird.f32 %v1182_v37 }
 0x649   :  { %v1164_v0 = vmul.f32 %v1469_v61, %v1162_v49  ;;  %vm1169_vm15 = vweird.f32 %v1469_v61 }
 0x64a   :  { %vm1170_vm1 = vmor %vm1168_vm0, %vm1169_vm15  ;;  %v1195_v50 = vor.u32 1.1754944e-38, %v1194_v32  ;;  %vm1193_vm6 = vcmp.eq.f32.partialorder %v1192_v33, 8.507059e+37 }
 0x64b   :  { %v1165_v53 = vsub.f32 1.0, %v1164_v0 }
 0x64d   :  { %v1166_v17 = vmul.f32 %v1469_v61, %v1165_v53 }
 0x64e   :  { %v1471_v2 = vpop.eup %1470 }
 0x64f   :  { %v1184_v58 = vmul.f32 %v1471_v2, %v1182_v37  ;;  %v1167_v3 = vadd.f32 %v1469_v61, %v1166_v17  ;;  %vm1189_vm3 = vweird.f32 %v1471_v2 }
 0x650   :  { %vm1190_vm5 = vmor %vm1188_vm4, %vm1189_vm3 }
 0x651   :  { %v1185_v7 = vsub.f32 1.0, %v1184_v58  ;;  %v1171_v20 = vsel %vm1170_vm1, %v1469_v61, %v1167_v3 }
 0x652   :  { %v1176_v13 = vsel %vm1173_vm2, %v1175_v4, %v1171_v20 }
 0x653   :  { %v1186_v28 = vmul.f32 %v1471_v2, %v1185_v7  ;;  %v1198_v51 = vmul.f32 %v1176_v13, %v1155_v12 }
 0x655   :  { %v1187_v44 = vadd.f32 %v1471_v2, %v1186_v28  ;;  %v1199_v14 = vadd.f32 %v1198_v51, %v371_v39 }
 0x657   :  { %v1191_v1 = vsel %vm1190_vm5, %v1471_v2, %v1187_v44  ;;  %1472 = vtanh.f32 %v1199_v14 }
 0x658   :  { %v1196_v40 = vsel %vm1193_vm6, %v1195_v50, %v1191_v1 }
 0x659   :  { %v1201_v55 = vsub.f32 1.0, %v1196_v40  ;;  %v1203_v60 = vmul.f32 %v1196_v40, %v1959_v45 }
 0x65d   :  { %v1473_v18 = vpop.eup %1472 }
 0x65e   :  { %v1202_v8 = vmul.f32 %v1473_v18, %v1201_v55 }
 0x660   :  { %v1204_v35 = vadd.f32 %v1203_v60, %v1202_v8 }
 0x662   :  { %1205 = vst.msk [vmem:[%s1994_s7] sm:$0xff] %vm431_vm11, %v1204_v35 }

</bundles_post_ra>
